<compile_context>
chip_gen: v5e
topology: v5e:2x2
jax: 0.10.0
libtpu: 0.0.40
codegen_flags: <defaults>
</compile_context>

<pallas_src>
import functools

import jax
import jax.numpy as jnp
import numpy as np
from jax import lax
from jax.experimental import pallas as pl
from jax.experimental.pallas import tpu as pltpu

KSIZE = 5
STRIDE = 2
NEG_SLOPE = 0.2


def _round_up(x, m):
    return (x + m - 1) // m * m


# -----------------------------------------------------------------------------
# Pallas kernel: LeakyReLU(scale * (A @ W) + bias).  bf16 operands, f32 acc.
# -----------------------------------------------------------------------------
def _dconv_kernel(scale_ref, a_ref, w_ref, b_ref, o_ref, *, negative_slope):
    acc = jnp.dot(a_ref[...], w_ref[...], preferred_element_type=jnp.float32)
    acc = acc * scale_ref[0] + b_ref[...]                       # f32 epilogue
    o_ref[...] = jnp.maximum(acc, acc * negative_slope).astype(o_ref.dtype)


def _matmul_scale_bias_lrelu(patches, w_pad, b_pad, scale, n_valid,
                             *, negative_slope=NEG_SLOPE):
    """LeakyReLU(scale * (patches @ w_pad) + b_pad)[:, :n_valid], bf16 out."""
    M, K = patches.shape
    Kp, Np = w_pad.shape                       # pre-padded to lane multiples

    TM = min(1024, _round_up(M, 16))           # one M tile per layer at toy size
    Mp = _round_up(M, TM)
    TN = 256 if Np % 256 == 0 else 128         # fill v6e/v7x 256-wide MXU

    a = jnp.pad(patches, ((0, Mp - M), (0, Kp - K)))   # bf16, lane-aligned

    grid = (Np // TN, Mp // TM)                # M innermost -> weights resident
    cost = pl.CostEstimate(
        flops=2 * Mp * Kp * Np,
        transcendentals=0,
        bytes_accessed=Mp * Kp * 2 + Kp * Np * 2 + Np * 4 + Mp * Np * 2,
    )
    # Double-buffered operand + output tiles, with headroom; clamp well under
    # v7x's 64 MiB physical VMEM.
    vmem_need = 2 * (TM * Kp * 2 + Kp * TN * 2 + TN * 4 + TM * TN * 2)
    vmem_limit = int(min(max(vmem_need + (4 << 20), 16 << 20), 48 << 20))

    out = pl.pallas_call(
        functools.partial(_dconv_kernel, negative_slope=negative_slope),
        out_shape=jax.ShapeDtypeStruct((Mp, Np), jnp.bfloat16),
        grid_spec=pltpu.PrefetchScalarGridSpec(
            num_scalar_prefetch=0,
            grid=grid,
            in_specs=[
                pl.BlockSpec(memory_space=pltpu.MemorySpace.SMEM),  # 1/sigma
                pl.BlockSpec((TM, Kp), lambda j, i: (i, 0)),        # patches
                pl.BlockSpec((Kp, TN), lambda j, i: (0, j)),        # weights
                pl.BlockSpec((1, TN), lambda j, i: (0, j)),         # bias
            ],
            out_specs=pl.BlockSpec((TM, TN), lambda j, i: (i, j)),
        ),
        compiler_params=pltpu.CompilerParams(
            dimension_semantics=("parallel", "parallel"),
            vmem_limit_bytes=vmem_limit),
        cost_estimate=cost,
    )(scale, a, w_pad, b_pad)
    return out[:M, :n_valid]


# -----------------------------------------------------------------------------
# JAX glue: spectral norm sigma, im2col (NHWC), packing, full forward.
# -----------------------------------------------------------------------------
def _spectral_sigma(w_mat, u, n_iter=1, eps=1e-12):
    """Power-iteration sigma matching Conv2DSpectralNorm (w_mat: (Cout, K))."""
    def l2n(x):
        return x / jnp.maximum(jnp.sqrt(jnp.sum(x * x, axis=0, keepdims=True)), eps)
    v = None
    for _ in range(n_iter):
        v = l2n(w_mat.T @ u)                  # (K, 1)
        u = l2n(w_mat @ v)                    # (Cout, 1)
    return (u.T @ w_mat @ v)[0, 0]


def _im2col_nhwc(x, k, stride, pad):
    """(B,H,W,C) -> (B*Ho*Wo, k*k*C); feature order (kh, kw, c)."""
    B, H, W, C = x.shape
    xp = jnp.pad(x, ((0, 0), (pad, pad), (pad, pad), (0, 0)))
    Ho = (H + 2 * pad - k) // stride + 1
    Wo = (W + 2 * pad - k) // stride + 1
    cols = []
    for kh in range(k):
        for kw in range(k):
            cols.append(xp[:, kh:kh + stride * (Ho - 1) + 1:stride,
                               kw:kw + stride * (Wo - 1) + 1:stride, :])
    p = jnp.stack(cols, axis=3)               # (B, Ho, Wo, k*k, C)
    return p.reshape(B * Ho * Wo, k * k * C), Ho, Wo


def pack_params(params):
    """One-time pre-pack: HWIO-flattened bf16 padded weight + padded f32 bias."""
    packed = []
    for (w, b, u) in params:
        cout, cin, k, _ = w.shape
        K = cin * k * k
        Kp = _round_up(K, 128)
        Np = _round_up(cout, 128)
        w_mat = w.reshape(cout, K)                                  # spectral norm
        w_hwio = jnp.transpose(w, (2, 3, 1, 0)).reshape(K, cout)    # (kh,kw,cin)->cout
        w_pad = jnp.pad(w_hwio.astype(jnp.bfloat16), ((0, Kp - K), (0, Np - cout)))
        b_pad = jnp.pad(b.astype(jnp.float32)[None, :], ((0, 0), (0, Np - cout)))
        packed.append((w_mat, u, w_pad, b_pad))
    return packed


def _dconv_forward(x_nhwc, layer):
    """One DConv layer.  x_nhwc: (B,H,W,Cin) bf16 -> (B,Ho,Wo,Cout) bf16."""
    w_mat, u, w_pad, b_pad = layer
    cout = w_mat.shape[0]
    pad = (KSIZE - 1) // 2
    sigma = _spectral_sigma(w_mat, u)
    scale = (1.0 / sigma).reshape(1).astype(jnp.float32)
    patches, Ho, Wo = _im2col_nhwc(x_nhwc, KSIZE, STRIDE, pad)
    y = _matmul_scale_bias_lrelu(patches, w_pad, b_pad, scale, cout)
    return y.reshape(x_nhwc.shape[0], Ho, Wo, cout)


def discriminator_forward(x_nchw, packed_params):
    """Pallas forward: NCHW f32 in, flattened features out (matches PyTorch)."""
    x = jnp.transpose(x_nchw, (0, 2, 3, 1)).astype(jnp.bfloat16)   # NHWC bf16
    for layer in packed_params:
        x = _dconv_forward(x, layer)
    B, H, W, _ = x.shape
    if H * W != 1:                      # preserve NCHW flatten order generally
        x = jnp.transpose(x, (0, 3, 1, 2))
    return x.reshape(B, -1)


def discriminator_reference(x_nchw, params):
    """Pure-JAX reference with the same bf16-operand / f32-accumulate contract."""
    x = x_nchw.astype(jnp.bfloat16)
    pad = (KSIZE - 1) // 2
    for (w, b, u) in params:
        sigma = _spectral_sigma(w.reshape(w.shape[0], -1), u)
        y = lax.conv_general_dilated(
            x, w.astype(jnp.bfloat16),
            window_strides=(STRIDE, STRIDE), padding=[(pad, pad), (pad, pad)],
            dimension_numbers=("NCHW", "OIHW", "NCHW"),
            preferred_element_type=jnp.float32)
        y = y / sigma + b[None, :, None, None]
        y = jnp.where(y >= 0.0, y, y * NEG_SLOPE)
        x = y.astype(jnp.bfloat16)
    return x.reshape(x.shape[0], -1)


def init_discriminator_params(key, cnum_in, cnum, ksize=KSIZE):
    channels = [cnum_in, cnum, 2 * cnum, 4 * cnum, 4 * cnum, 4 * cnum, 4 * cnum]
    params = []
    for i in range(6):
        key, kw, kb, ku = jax.random.split(key, 4)
        cin, cout = channels[i], channels[i + 1]
        fan_in = cin * ksize * ksize
        w = jax.random.normal(kw, (cout, cin, ksize, ksize), jnp.float32) / np.sqrt(fan_in)
        b = jax.random.uniform(kb, (cout,), jnp.float32, -0.1, 0.1)
        u = jax.random.truncated_normal(ku, -2.0, 2.0, (cout, 1), jnp.float32)
        params.append((w, b, u))
    return params


# -----------------------------------------------------------------------------
if __name__ == "__main__":
    key = jax.random.PRNGKey(0)
    kx, kp = jax.random.split(key)

    cnum_in, cnum = 4, 16
    # NCHW input; 6 stride-2 convs: 16 -> 8 -> 4 -> 2 -> 1 -> 1 -> 1
    x = jax.random.normal(kx, (2, cnum_in, 16, 16), dtype=jnp.float32)
    params = init_discriminator_params(kp, cnum_in, cnum)
    packed = pack_params(params)            # one-time weight packing

    fwd_pallas = jax.jit(discriminator_forward)
    y = jax.block_until_ready(fwd_pallas(x, packed))

    fwd_ref = jax.jit(discriminator_reference)
    y_ref = jax.block_until_ready(fwd_ref(x, params))

    np.testing.assert_allclose(np.asarray(y, dtype=np.float32),
                               np.asarray(y_ref, dtype=np.float32),
                               rtol=2e-2, atol=2e-2)
    assert y.shape == (2, 4 * cnum * 1 * 1)

    print("KERNEL_OK")
</pallas_src>

<mosaic_0001>
module attributes {stable_mosaic.version = 11 : i64} {
  func.func @_dconv_kernel(%arg0: i32, %arg1: i32, %arg2: memref<1xf32, #tpu.memory_space<smem>>, %arg3: memref<128x128xbf16, #tpu.memory_space<vmem>>, %arg4: memref<128x128xbf16, #tpu.memory_space<vmem>>, %arg5: memref<1x128xf32, #tpu.memory_space<vmem>>, %arg6: memref<128x128xbf16, #tpu.memory_space<vmem>>) attributes {dimension_semantics = [#tpu.dimension_semantics<parallel>, #tpu.dimension_semantics<parallel>], iteration_bounds = array<i64: 1, 1>, scalar_prefetch = 0 : i64, scratch_operands = 0 : i64, tpu.core_type = #tpu.core_type<tc>, window_params = [{transform_indices = @transform_0, window_bounds = array<i64: 1>}, {transform_indices = @transform_1, window_bounds = array<i64: 128, 128>}, {transform_indices = @transform_2, window_bounds = array<i64: 128, 128>}, {transform_indices = @transform_3, window_bounds = array<i64: 1, 128>}, {transform_indices = @transform_4, window_bounds = array<i64: 128, 128>}]} {
    %c0 = arith.constant 0 : index
    %c0_0 = arith.constant 0 : index
    %0 = vector.load %arg3[%c0, %c0_0] : memref<128x128xbf16, #tpu.memory_space<vmem>>, vector<128x128xbf16>
    %c0_1 = arith.constant 0 : index
    %c0_2 = arith.constant 0 : index
    %1 = vector.load %arg4[%c0_1, %c0_2] : memref<128x128xbf16, #tpu.memory_space<vmem>>, vector<128x128xbf16>
    %cst = arith.constant dense<0.000000e+00> : vector<128x128xf32>
    %2 = tpu.matmul %0, %1, %cst {dimension_numbers = #tpu.dot_dimension_numbers<[1], [0], [0], [1], [0, 0, 1, 1], [], []>} : vector<128x128xbf16>, vector<128x128xbf16>, vector<128x128xf32> -> vector<128x128xf32>
    %c0_3 = arith.constant 0 : index
    %3 = memref.load %arg2[%c0_3] : memref<1xf32, #tpu.memory_space<smem>>
    %4 = vector.broadcast %3 : f32 to vector<128x128xf32>
    %5 = arith.mulf %2, %4 : vector<128x128xf32>
    %c0_4 = arith.constant 0 : index
    %c0_5 = arith.constant 0 : index
    %6 = vector.load %arg5[%c0_4, %c0_5] : memref<1x128xf32, #tpu.memory_space<vmem>>, vector<1x128xf32>
    %7 = vector.broadcast %6 : vector<1x128xf32> to vector<128x128xf32>
    %8 = arith.addf %5, %7 : vector<128x128xf32>
    %cst_6 = arith.constant 2.000000e-01 : f32
    %9 = vector.broadcast %cst_6 : f32 to vector<128x128xf32>
    %10 = arith.mulf %8, %9 : vector<128x128xf32>
    %11 = arith.maximumf %8, %10 : vector<128x128xf32>
    %12 = arith.truncf %11 : vector<128x128xf32> to vector<128x128xbf16>
    %c0_7 = arith.constant 0 : index
    %c0_8 = arith.constant 0 : index
    %13 = vector.load %arg6[%c0_7, %c0_8] : memref<128x128xbf16, #tpu.memory_space<vmem>>, vector<128x128xbf16>
    tpu.vector_store %arg6[%c0_7, %c0_8], %12 {strides = array<i32>} : memref<128x128xbf16, #tpu.memory_space<vmem>>, vector<128x128xbf16>,
    return
  }
  func.func @transform_0(%arg0: i32, %arg1: i32) -> i32 {
    %c0_i32 = arith.constant 0 : i32
    %c0_i32_0 = arith.constant 0 : i32
    return %c0_i32 : i32
  }
  func.func @transform_1(%arg0: i32, %arg1: i32) -> (i32, i32) {
    %c0_i32 = arith.constant 0 : i32
    %c0_i32_0 = arith.constant 0 : i32
    return %arg1, %c0_i32 : i32, i32
  }
  func.func @transform_2(%arg0: i32, %arg1: i32) -> (i32, i32) {
    %c0_i32 = arith.constant 0 : i32
    %c0_i32_0 = arith.constant 0 : i32
    return %c0_i32, %arg0 : i32, i32
  }
  func.func @transform_3(%arg0: i32, %arg1: i32) -> (i32, i32) {
    %c0_i32 = arith.constant 0 : i32
    %c0_i32_0 = arith.constant 0 : i32
    return %c0_i32, %arg0 : i32, i32
  }
  func.func @transform_4(%arg0: i32, %arg1: i32) -> (i32, i32) {
    %c0_i32 = arith.constant 0 : i32
    return %arg1, %arg0 : i32, i32
  }
}

module attributes {stable_mosaic.version = 11 : i64} {
  func.func @_dconv_kernel(%arg0: i32, %arg1: i32, %arg2: memref<1xf32, #tpu.memory_space<smem>>, %arg3: memref<32x512xbf16, #tpu.memory_space<vmem>>, %arg4: memref<512x128xbf16, #tpu.memory_space<vmem>>, %arg5: memref<1x128xf32, #tpu.memory_space<vmem>>, %arg6: memref<32x128xbf16, #tpu.memory_space<vmem>>) attributes {dimension_semantics = [#tpu.dimension_semantics<parallel>, #tpu.dimension_semantics<parallel>], iteration_bounds = array<i64: 1, 1>, scalar_prefetch = 0 : i64, scratch_operands = 0 : i64, tpu.core_type = #tpu.core_type<tc>, window_params = [{transform_indices = @transform_0, window_bounds = array<i64: 1>}, {transform_indices = @transform_1, window_bounds = array<i64: 32, 512>}, {transform_indices = @transform_2, window_bounds = array<i64: 512, 128>}, {transform_indices = @transform_3, window_bounds = array<i64: 1, 128>}, {transform_indices = @transform_4, window_bounds = array<i64: 32, 128>}]} {
    %c0 = arith.constant 0 : index
    %c0_0 = arith.constant 0 : index
    %0 = vector.load %arg3[%c0, %c0_0] : memref<32x512xbf16, #tpu.memory_space<vmem>>, vector<32x512xbf16>
    %c0_1 = arith.constant 0 : index
    %c0_2 = arith.constant 0 : index
    %1 = vector.load %arg4[%c0_1, %c0_2] : memref<512x128xbf16, #tpu.memory_space<vmem>>, vector<512x128xbf16>
    %cst = arith.constant dense<0.000000e+00> : vector<32x128xf32>
    %2 = tpu.matmul %0, %1, %cst {dimension_numbers = #tpu.dot_dimension_numbers<[1], [0], [0], [1], [0, 0, 1, 1], [], []>} : vector<32x512xbf16>, vector<512x128xbf16>, vector<32x128xf32> -> vector<32x128xf32>
    %c0_3 = arith.constant 0 : index
    %3 = memref.load %arg2[%c0_3] : memref<1xf32, #tpu.memory_space<smem>>
    %4 = vector.broadcast %3 : f32 to vector<32x128xf32>
    %5 = arith.mulf %2, %4 : vector<32x128xf32>
    %c0_4 = arith.constant 0 : index
    %c0_5 = arith.constant 0 : index
    %6 = vector.load %arg5[%c0_4, %c0_5] : memref<1x128xf32, #tpu.memory_space<vmem>>, vector<1x128xf32>
    %7 = vector.broadcast %6 : vector<1x128xf32> to vector<32x128xf32>
    %8 = arith.addf %5, %7 : vector<32x128xf32>
    %cst_6 = arith.constant 2.000000e-01 : f32
    %9 = vector.broadcast %cst_6 : f32 to vector<32x128xf32>
    %10 = arith.mulf %8, %9 : vector<32x128xf32>
    %11 = arith.maximumf %8, %10 : vector<32x128xf32>
    %12 = arith.truncf %11 : vector<32x128xf32> to vector<32x128xbf16>
    %c0_7 = arith.constant 0 : index
    %c0_8 = arith.constant 0 : index
    %13 = vector.load %arg6[%c0_7, %c0_8] : memref<32x128xbf16, #tpu.memory_space<vmem>>, vector<32x128xbf16>
    tpu.vector_store %arg6[%c0_7, %c0_8], %12 {strides = array<i32>} : memref<32x128xbf16, #tpu.memory_space<vmem>>, vector<32x128xbf16>,
    return
  }
  func.func @transform_0(%arg0: i32, %arg1: i32) -> i32 {
    %c0_i32 = arith.constant 0 : i32
    %c0_i32_0 = arith.constant 0 : i32
    return %c0_i32 : i32
  }
  func.func @transform_1(%arg0: i32, %arg1: i32) -> (i32, i32) {
    %c0_i32 = arith.constant 0 : i32
    %c0_i32_0 = arith.constant 0 : i32
    return %arg1, %c0_i32 : i32, i32
  }
  func.func @transform_2(%arg0: i32, %arg1: i32) -> (i32, i32) {
    %c0_i32 = arith.constant 0 : i32
    %c0_i32_0 = arith.constant 0 : i32
    return %c0_i32, %arg0 : i32, i32
  }
  func.func @transform_3(%arg0: i32, %arg1: i32) -> (i32, i32) {
    %c0_i32 = arith.constant 0 : i32
    %c0_i32_0 = arith.constant 0 : i32
    return %c0_i32, %arg0 : i32, i32
  }
  func.func @transform_4(%arg0: i32, %arg1: i32) -> (i32, i32) {
    %c0_i32 = arith.constant 0 : i32
    return %arg1, %arg0 : i32, i32
  }
}

module attributes {stable_mosaic.version = 11 : i64} {
  func.func @_dconv_kernel(%arg0: i32, %arg1: i32, %arg2: memref<1xf32, #tpu.memory_space<smem>>, %arg3: memref<16x896xbf16, #tpu.memory_space<vmem>>, %arg4: memref<896x128xbf16, #tpu.memory_space<vmem>>, %arg5: memref<1x128xf32, #tpu.memory_space<vmem>>, %arg6: memref<16x128xbf16, #tpu.memory_space<vmem>>) attributes {dimension_semantics = [#tpu.dimension_semantics<parallel>, #tpu.dimension_semantics<parallel>], iteration_bounds = array<i64: 1, 1>, scalar_prefetch = 0 : i64, scratch_operands = 0 : i64, tpu.core_type = #tpu.core_type<tc>, window_params = [{transform_indices = @transform_0, window_bounds = array<i64: 1>}, {transform_indices = @transform_1, window_bounds = array<i64: 16, 896>}, {transform_indices = @transform_2, window_bounds = array<i64: 896, 128>}, {transform_indices = @transform_3, window_bounds = array<i64: 1, 128>}, {transform_indices = @transform_4, window_bounds = array<i64: 16, 128>}]} {
    %c0 = arith.constant 0 : index
    %c0_0 = arith.constant 0 : index
    %0 = vector.load %arg3[%c0, %c0_0] : memref<16x896xbf16, #tpu.memory_space<vmem>>, vector<16x896xbf16>
    %c0_1 = arith.constant 0 : index
    %c0_2 = arith.constant 0 : index
    %1 = vector.load %arg4[%c0_1, %c0_2] : memref<896x128xbf16, #tpu.memory_space<vmem>>, vector<896x128xbf16>
    %cst = arith.constant dense<0.000000e+00> : vector<16x128xf32>
    %2 = tpu.matmul %0, %1, %cst {dimension_numbers = #tpu.dot_dimension_numbers<[1], [0], [0], [1], [0, 0, 1, 1], [], []>} : vector<16x896xbf16>, vector<896x128xbf16>, vector<16x128xf32> -> vector<16x128xf32>
    %c0_3 = arith.constant 0 : index
    %3 = memref.load %arg2[%c0_3] : memref<1xf32, #tpu.memory_space<smem>>
    %4 = vector.broadcast %3 : f32 to vector<16x128xf32>
    %5 = arith.mulf %2, %4 : vector<16x128xf32>
    %c0_4 = arith.constant 0 : index
    %c0_5 = arith.constant 0 : index
    %6 = vector.load %arg5[%c0_4, %c0_5] : memref<1x128xf32, #tpu.memory_space<vmem>>, vector<1x128xf32>
    %7 = vector.broadcast %6 : vector<1x128xf32> to vector<16x128xf32>
    %8 = arith.addf %5, %7 : vector<16x128xf32>
    %cst_6 = arith.constant 2.000000e-01 : f32
    %9 = vector.broadcast %cst_6 : f32 to vector<16x128xf32>
    %10 = arith.mulf %8, %9 : vector<16x128xf32>
    %11 = arith.maximumf %8, %10 : vector<16x128xf32>
    %12 = arith.truncf %11 : vector<16x128xf32> to vector<16x128xbf16>
    %c0_7 = arith.constant 0 : index
    %c0_8 = arith.constant 0 : index
    %13 = vector.load %arg6[%c0_7, %c0_8] : memref<16x128xbf16, #tpu.memory_space<vmem>>, vector<16x128xbf16>
    tpu.vector_store %arg6[%c0_7, %c0_8], %12 {strides = array<i32>} : memref<16x128xbf16, #tpu.memory_space<vmem>>, vector<16x128xbf16>,
    return
  }
  func.func @transform_0(%arg0: i32, %arg1: i32) -> i32 {
    %c0_i32 = arith.constant 0 : i32
    %c0_i32_0 = arith.constant 0 : i32
    return %c0_i32 : i32
  }
  func.func @transform_1(%arg0: i32, %arg1: i32) -> (i32, i32) {
    %c0_i32 = arith.constant 0 : i32
    %c0_i32_0 = arith.constant 0 : i32
    return %arg1, %c0_i32 : i32, i32
  }
  func.func @transform_2(%arg0: i32, %arg1: i32) -> (i32, i32) {
    %c0_i32 = arith.constant 0 : i32
    %c0_i32_0 = arith.constant 0 : i32
    return %c0_i32, %arg0 : i32, i32
  }
  func.func @transform_3(%arg0: i32, %arg1: i32) -> (i32, i32) {
    %c0_i32 = arith.constant 0 : i32
    %c0_i32_0 = arith.constant 0 : i32
    return %c0_i32, %arg0 : i32, i32
  }
  func.func @transform_4(%arg0: i32, %arg1: i32) -> (i32, i32) {
    %c0_i32 = arith.constant 0 : i32
    return %arg1, %arg0 : i32, i32
  }
}

module attributes {stable_mosaic.version = 11 : i64} {
  func.func @_dconv_kernel(%arg0: i32, %arg1: i32, %arg2: memref<1xf32, #tpu.memory_space<smem>>, %arg3: memref<16x1664xbf16, #tpu.memory_space<vmem>>, %arg4: memref<1664x128xbf16, #tpu.memory_space<vmem>>, %arg5: memref<1x128xf32, #tpu.memory_space<vmem>>, %arg6: memref<16x128xbf16, #tpu.memory_space<vmem>>) attributes {dimension_semantics = [#tpu.dimension_semantics<parallel>, #tpu.dimension_semantics<parallel>], iteration_bounds = array<i64: 1, 1>, scalar_prefetch = 0 : i64, scratch_operands = 0 : i64, tpu.core_type = #tpu.core_type<tc>, window_params = [{transform_indices = @transform_0, window_bounds = array<i64: 1>}, {transform_indices = @transform_1, window_bounds = array<i64: 16, 1664>}, {transform_indices = @transform_2, window_bounds = array<i64: 1664, 128>}, {transform_indices = @transform_3, window_bounds = array<i64: 1, 128>}, {transform_indices = @transform_4, window_bounds = array<i64: 16, 128>}]} {
    %c0 = arith.constant 0 : index
    %c0_0 = arith.constant 0 : index
    %0 = vector.load %arg3[%c0, %c0_0] : memref<16x1664xbf16, #tpu.memory_space<vmem>>, vector<16x1664xbf16>
    %c0_1 = arith.constant 0 : index
    %c0_2 = arith.constant 0 : index
    %1 = vector.load %arg4[%c0_1, %c0_2] : memref<1664x128xbf16, #tpu.memory_space<vmem>>, vector<1664x128xbf16>
    %cst = arith.constant dense<0.000000e+00> : vector<16x128xf32>
    %2 = tpu.matmul %0, %1, %cst {dimension_numbers = #tpu.dot_dimension_numbers<[1], [0], [0], [1], [0, 0, 1, 1], [], []>} : vector<16x1664xbf16>, vector<1664x128xbf16>, vector<16x128xf32> -> vector<16x128xf32>
    %c0_3 = arith.constant 0 : index
    %3 = memref.load %arg2[%c0_3] : memref<1xf32, #tpu.memory_space<smem>>
    %4 = vector.broadcast %3 : f32 to vector<16x128xf32>
    %5 = arith.mulf %2, %4 : vector<16x128xf32>
    %c0_4 = arith.constant 0 : index
    %c0_5 = arith.constant 0 : index
    %6 = vector.load %arg5[%c0_4, %c0_5] : memref<1x128xf32, #tpu.memory_space<vmem>>, vector<1x128xf32>
    %7 = vector.broadcast %6 : vector<1x128xf32> to vector<16x128xf32>
    %8 = arith.addf %5, %7 : vector<16x128xf32>
    %cst_6 = arith.constant 2.000000e-01 : f32
    %9 = vector.broadcast %cst_6 : f32 to vector<16x128xf32>
    %10 = arith.mulf %8, %9 : vector<16x128xf32>
    %11 = arith.maximumf %8, %10 : vector<16x128xf32>
    %12 = arith.truncf %11 : vector<16x128xf32> to vector<16x128xbf16>
    %c0_7 = arith.constant 0 : index
    %c0_8 = arith.constant 0 : index
    %13 = vector.load %arg6[%c0_7, %c0_8] : memref<16x128xbf16, #tpu.memory_space<vmem>>, vector<16x128xbf16>
    tpu.vector_store %arg6[%c0_7, %c0_8], %12 {strides = array<i32>} : memref<16x128xbf16, #tpu.memory_space<vmem>>, vector<16x128xbf16>,
    return
  }
  func.func @transform_0(%arg0: i32, %arg1: i32) -> i32 {
    %c0_i32 = arith.constant 0 : i32
    %c0_i32_0 = arith.constant 0 : i32
    return %c0_i32 : i32
  }
  func.func @transform_1(%arg0: i32, %arg1: i32) -> (i32, i32) {
    %c0_i32 = arith.constant 0 : i32
    %c0_i32_0 = arith.constant 0 : i32
    return %arg1, %c0_i32 : i32, i32
  }
  func.func @transform_2(%arg0: i32, %arg1: i32) -> (i32, i32) {
    %c0_i32 = arith.constant 0 : i32
    %c0_i32_0 = arith.constant 0 : i32
    return %c0_i32, %arg0 : i32, i32
  }
  func.func @transform_3(%arg0: i32, %arg1: i32) -> (i32, i32) {
    %c0_i32 = arith.constant 0 : i32
    %c0_i32_0 = arith.constant 0 : i32
    return %c0_i32, %arg0 : i32, i32
  }
  func.func @transform_4(%arg0: i32, %arg1: i32) -> (i32, i32) {
    %c0_i32 = arith.constant 0 : i32
    return %arg1, %arg0 : i32, i32
  }
}

</mosaic_0001>

<bundles_post_ra>
// kernel: discriminator_forward.6
= control target key start
LH: loop header
LB: loop body
LE: loop exit
PB: predicated region body
PF: predicated region fallthrough
CT: control target
= control target key end

     0   :  { %s592_s2 = inlined_call_operand.vmem [shape: bf16[128,128], index: 2, kind: input, shape index: {}]   ;;  %s593_s3 = inlined_call_operand.vmem [shape: f32[1,128], index: 3, kind: input, shape index: {}]   ;;  %s594_s1 = inlined_call_operand.vmem [shape: bf16[128,128], index: 1, kind: input, shape index: {}]   ;;  %s595_s0 = inlined_call_operand.<no memory space> [shape: f32[1], index: 0, kind: input, shape index: {}]   ;;  %s596_s4 = inlined_call_operand.vmem [shape: bf16[128,128], index: 4, kind: output, shape index: {}]  }
   0x1   :  { %v380_v0 = vld [vmem:[%s592_s2 + $0x38] sm:$0xff]  ;;  %v379_v1 = vld [vmem:[%s592_s2 + $0x30] sm:$0xff]  ;;  %v378_v2 = vld [vmem:[%s592_s2 + $0x28] sm:$0xff]  ;;  %v529_v17 = vstv %s595_s0 }
   0x2   :  { %146 = vmatpush.bf16.msra.mxu0 %v380_v0  ;;  %428 = vmatpush.bf16.msra.mxu1 %v380_v0  ;;  %v377_v3 = vld [vmem:[%s592_s2 + $0x20] sm:$0xff]  ;;  %v376_v4 = vld [vmem:[%s592_s2 + $0x18] sm:$0xff]  ;;  %v375_v5 = vld [vmem:[%s592_s2 + $0x10] sm:$0xff] }
   0x3   :  { %429 = vmatpush.bf16.msra.mxu2 %v380_v0  ;;  %430 = vmatpush.bf16.msra.mxu3 %v380_v0  ;;  %v374_v6 = vld [vmem:[%s592_s2 + $0x8] sm:$0xff]  ;;  %v373_v7 = vld [vmem:[%s592_s2] sm:$0xff]  ;;  %v367_v9 = vld [vmem:[%s594_s1 + $0x10] sm:$0xff] }
   0x4   :  { %v365_v8 = vld [vmem:[%s594_s1] sm:$0xff]  ;;  %v371_v11 = vld [vmem:[%s594_s1 + $0x30] sm:$0xff]  ;;  %v366_v12 = vld [vmem:[%s594_s1 + $0x8] sm:$0xff] }
   0x5   :  { %v369_v10 = vld [vmem:[%s594_s1 + $0x20] sm:$0xff]  ;;  %v368_v13 = vld [vmem:[%s594_s1 + $0x18] sm:$0xff]  ;;  %v370_v14 = vld [vmem:[%s594_s1 + $0x28] sm:$0xff] }
   0x6   :  { %147 = vmatpush.bf16.msra.mxu0 %v379_v1  ;;  %431 = vmatpush.bf16.msra.mxu1 %v379_v1  ;;  %v372_v15 = vld [vmem:[%s594_s1 + $0x38] sm:$0xff]  ;;  %v535_v20 = vld [vmem:[%s593_s3] ss:$0 sm:$0xff] }
   0x7   :  { %432 = vmatpush.bf16.msra.mxu2 %v379_v1  ;;  %433 = vmatpush.bf16.msra.mxu3 %v379_v1 }
   0xa   :  { %148 = vmatpush.bf16.msra.mxu0 %v378_v2  ;;  %434 = vmatpush.bf16.msra.mxu1 %v378_v2 }
   0xb   :  { %435 = vmatpush.bf16.msra.mxu2 %v378_v2  ;;  %436 = vmatpush.bf16.msra.mxu3 %v378_v2 }
   0xe   :  { %149 = vmatpush.bf16.msra.mxu0 %v377_v3  ;;  %437 = vmatpush.bf16.msra.mxu1 %v377_v3 }
   0xf   :  { %438 = vmatpush.bf16.msra.mxu2 %v377_v3  ;;  %439 = vmatpush.bf16.msra.mxu3 %v377_v3 }
  0x12   :  { %150 = vmatpush.bf16.msra.mxu0 %v376_v4  ;;  %440 = vmatpush.bf16.msra.mxu1 %v376_v4 }
  0x13   :  { %441 = vmatpush.bf16.msra.mxu2 %v376_v4  ;;  %442 = vmatpush.bf16.msra.mxu3 %v376_v4 }
  0x16   :  { %151 = vmatpush.bf16.msra.mxu0 %v375_v5  ;;  %443 = vmatpush.bf16.msra.mxu1 %v375_v5 }
  0x17   :  { %444 = vmatpush.bf16.msra.mxu2 %v375_v5  ;;  %445 = vmatpush.bf16.msra.mxu3 %v375_v5 }
  0x1a   :  { %152 = vmatpush.bf16.msra.mxu0 %v374_v6  ;;  %446 = vmatpush.bf16.msra.mxu1 %v374_v6 }
  0x1b   :  { %447 = vmatpush.bf16.msra.mxu2 %v374_v6  ;;  %448 = vmatpush.bf16.msra.mxu3 %v374_v6 }
  0x1e   :  { %153 = vmatpush.bf16.msra.mxu0 %v373_v7  ;;  %449 = vmatpush.bf16.msra.mxu1 %v373_v7 }
  0x1f   :  { %450 = vmatpush.bf16.msra.mxu2 %v373_v7  ;;  %451 = vmatpush.bf16.msra.mxu3 %v373_v7 }
  0x21   :  { %154 = vmatmul.bf16.vlgmr.msra.gmra.mxu0 %v365_v8  ;;  %164 = vmatmul.bf16.vlgmr.msra.gmra.mxu1 %v367_v9 }
  0x22   :  { %174 = vmatmul.bf16.vlgmr.msra.gmra.mxu2 %v369_v10  ;;  %184 = vmatmul.bf16.vlgmr.msra.gmra.mxu3 %v371_v11 }
  0x31   :  { %159 = vmatmul.bf16.gmra.mxu0 %v366_v12  ;;  %169 = vmatmul.bf16.gmra.mxu1 %v368_v13 }
  0x32   :  { %179 = vmatmul.bf16.gmra.mxu2 %v370_v14  ;;  %189 = vmatmul.bf16.gmra.mxu3 %v372_v15 }
  0x9e   :  { %v155_v16 = vpop.f32.mrf.mxu0  ;;  %v165_v18 = vpop.f32.mrf.mxu1 }
  0x9f   :  { %v197_v19 = vmul.f32 %v529_v17, %v155_v16  ;;  %v201_v21 = vmul.f32 %v529_v17, %v165_v18 }
  0xa1   :  { %v217_v22 = vadd.f32 %v535_v20, %v197_v19  ;;  %v221_v23 = vadd.f32 %v535_v20, %v201_v21 }
  0xa3   :  { %v233_v32 = vmul.f32 0.2, %v217_v22  ;;  %v237_v33 = vmul.f32 0.2, %v221_v23 }
  0xa5   :  { %v175_v24 = vpop.f32.mrf.mxu2  ;;  %v185_v25 = vpop.f32.mrf.mxu3  ;;  %v249_v40 = vmax.f32 %v217_v22, %v233_v32  ;;  %v253_v41 = vmax.f32 %v221_v23, %v237_v33 }
  0xa6   :  { %v157_v26 = vpop.f32.mrf.mxu0  ;;  %v167_v27 = vpop.f32.mrf.mxu1  ;;  %v205_v30 = vmul.f32 %v529_v17, %v175_v24  ;;  %v209_v31 = vmul.f32 %v529_v17, %v185_v25 }
  0xa7   :  { %v198_v28 = vmul.f32 %v529_v17, %v157_v26  ;;  %v202_v29 = vmul.f32 %v529_v17, %v167_v27 }
  0xa8   :  { %v225_v38 = vadd.f32 %v535_v20, %v205_v30  ;;  %v229_v39 = vadd.f32 %v535_v20, %v209_v31 }
  0xa9   :  { %v218_v34 = vadd.f32 %v535_v20, %v198_v28  ;;  %v222_v35 = vadd.f32 %v535_v20, %v202_v29 }
  0xaa   :  { %v241_v52 = vmul.f32 0.2, %v225_v38  ;;  %v245_v53 = vmul.f32 0.2, %v229_v39 }
  0xab   :  { %v234_v36 = vmul.f32 0.2, %v218_v34  ;;  %v238_v37 = vmul.f32 0.2, %v222_v35 }
  0xac   :  { %v257_v60 = vmax.f32 %v225_v38, %v241_v52  ;;  %v261_v61 = vmax.f32 %v229_v39, %v245_v53 }
  0xad   :  { %v250_v42 = vmax.f32 %v218_v34, %v234_v36  ;;  %v254_v43 = vmax.f32 %v222_v35, %v238_v37  ;;  %v177_v44 = vpop.f32.mrf.mxu2  ;;  %v187_v45 = vpop.f32.mrf.mxu3 }
  0xae   :  { %v206_v46 = vmul.f32 %v529_v17, %v177_v44  ;;  %v210_v47 = vmul.f32 %v529_v17, %v187_v45  ;;  %v160_v48 = vpop.f32.mrf.mxu0  ;;  %v170_v49 = vpop.f32.mrf.mxu1 }
  0xaf   :  { %v384_v50 = vpack.c.bf16 %v250_v42, %v249_v40  ;;  %v394_v51 = vpack.c.bf16 %v254_v43, %v253_v41  ;;  %v199_v56 = vmul.f32 %v529_v17, %v160_v48  ;;  %v203_v57 = vmul.f32 %v529_v17, %v170_v49 }
  0xb0   :  { %v226_v54 = vadd.f32 %v535_v20, %v206_v46  ;;  %v230_v55 = vadd.f32 %v535_v20, %v210_v47 }
  0xb1   :  { %385 = vst [vmem:[%s596_s4] sm:$0xff] %v384_v50   ;;  %v219_v0 = vadd.f32 %v535_v20, %v199_v56  ;;  %v223_v1 = vadd.f32 %v535_v20, %v203_v57 }
  0xb2   :  { %422 = vst [vmem:[%s596_s4 + $0x10] sm:$0xff] %v394_v51   ;;  %v242_v58 = vmul.f32 0.2, %v226_v54  ;;  %v246_v59 = vmul.f32 0.2, %v230_v55 }
  0xb3   :  { %v235_v12 = vmul.f32 0.2, %v219_v0  ;;  %v239_v13 = vmul.f32 0.2, %v223_v1 }
  0xb4   :  { %v258_v62 = vmax.f32 %v226_v54, %v242_v58  ;;  %v262_v63 = vmax.f32 %v230_v55, %v246_v59 }
  0xb5   :  { %v180_v2 = vpop.f32.mrf.mxu2  ;;  %v190_v3 = vpop.f32.mrf.mxu3  ;;  %v251_v22 = vmax.f32 %v219_v0, %v235_v12  ;;  %v255_v23 = vmax.f32 %v223_v1, %v239_v13 }
  0xb6   :  { %v404_v4 = vpack.c.bf16 %v258_v62, %v257_v60  ;;  %v414_v5 = vpack.c.bf16 %v262_v63, %v261_v61  ;;  %v162_v6 = vpop.f32.mrf.mxu0  ;;  %v172_v7 = vpop.f32.mrf.mxu1  ;;  %v207_v10 = vmul.f32 %v529_v17, %v180_v2  ;;  %v211_v11 = vmul.f32 %v529_v17, %v190_v3 }
  0xb7   :  { %v200_v8 = vmul.f32 %v529_v17, %v162_v6  ;;  %v204_v9 = vmul.f32 %v529_v17, %v172_v7 }
  0xb8   :  { %424 = vst [vmem:[%s596_s4 + $0x20] sm:$0xff] %v404_v4   ;;  %v227_v19 = vadd.f32 %v535_v20, %v207_v10  ;;  %v231_v21 = vadd.f32 %v535_v20, %v211_v11 }
  0xb9   :  { %426 = vst [vmem:[%s596_s4 + $0x30] sm:$0xff] %v414_v5   ;;  %v220_v14 = vadd.f32 %v535_v20, %v200_v8  ;;  %v224_v15 = vadd.f32 %v535_v20, %v204_v9 }
  0xba   :  { %v243_v32 = vmul.f32 0.2, %v227_v19  ;;  %v247_v33 = vmul.f32 0.2, %v231_v21 }
  0xbb   :  { %v236_v16 = vmul.f32 0.2, %v220_v14  ;;  %v240_v18 = vmul.f32 0.2, %v224_v15 }
  0xbc   :  { %v259_v38 = vmax.f32 %v227_v19, %v243_v32 }
  0xbd   :  { %v252_v24 = vmax.f32 %v220_v14, %v236_v16  ;;  %v256_v25 = vmax.f32 %v224_v15, %v240_v18  ;;  %v182_v26 = vpop.f32.mrf.mxu2  ;;  %v192_v27 = vpop.f32.mrf.mxu3 }
  0xbe   :  { %v208_v28 = vmul.f32 %v529_v17, %v182_v26  ;;  %v212_v29 = vmul.f32 %v529_v17, %v192_v27  ;;  %v263_v17 = vmax.f32 %v231_v21, %v247_v33 }
  0xbf   :  { %v389_v30 = vpack.c.bf16 %v252_v24, %v251_v22  ;;  %v399_v31 = vpack.c.bf16 %v256_v25, %v255_v23 }
  0xc0   :  { %v228_v34 = vadd.f32 %v535_v20, %v208_v28  ;;  %v232_v35 = vadd.f32 %v535_v20, %v212_v29 }
  0xc1   :  { %421 = vst [vmem:[%s596_s4 + $0x8] sm:$0xff] %v389_v30  }
  0xc2   :  { %423 = vst [vmem:[%s596_s4 + $0x18] sm:$0xff] %v399_v31   ;;  %v244_v36 = vmul.f32 0.2, %v228_v34  ;;  %v248_v37 = vmul.f32 0.2, %v232_v35 }
  0xc4   :  { %v260_v39 = vmax.f32 %v228_v34, %v244_v36  ;;  %v264_v40 = vmax.f32 %v232_v35, %v248_v37 }
  0xc6   :  { %v409_v41 = vpack.c.bf16 %v260_v39, %v259_v38  ;;  %v419_v42 = vpack.c.bf16 %v264_v40, %v263_v17 }
  0xc8   :  { %425 = vst [vmem:[%s596_s4 + $0x28] sm:$0xff] %v409_v41  }
  0xc9   :  { %427 = vst [vmem:[%s596_s4 + $0x38] sm:$0xff] %v419_v42  }

// kernel: discriminator_forward.7
= control target key start
LH: loop header
LB: loop body
LE: loop exit
PB: predicated region body
PF: predicated region fallthrough
CT: control target
= control target key end

     0   :  { %s825_s2 = inlined_call_operand.vmem [shape: bf16[512,128], index: 2, kind: input, shape index: {}]   ;;  %s826_s1 = inlined_call_operand.vmem [shape: bf16[32,512], index: 1, kind: input, shape index: {}]   ;;  %s827_s3 = inlined_call_operand.vmem [shape: f32[1,128], index: 3, kind: input, shape index: {}]   ;;  %s828_s0 = inlined_call_operand.<no memory space> [shape: f32[1], index: 0, kind: input, shape index: {}]   ;;  %s829_s4 = inlined_call_operand.vmem [shape: bf16[32,128], index: 4, kind: output, shape index: {}]  }
   0x1   :  { %v607_v0 = vld [vmem:[%s825_s2 + $0x38] sm:$0xff]  ;;  %v606_v4 = vld [vmem:[%s825_s2 + $0x30] sm:$0xff]  ;;  %v605_v8 = vld [vmem:[%s825_s2 + $0x28] sm:$0xff] }
   0x2   :  { %v615_v1 = vld [vmem:[%s825_s2 + $0x78] sm:$0xff]  ;;  %322 = vmatpush.bf16.msra.mxu0 %v607_v0  ;;  %v614_v5 = vld [vmem:[%s825_s2 + $0x70] sm:$0xff]  ;;  %v613_v9 = vld [vmem:[%s825_s2 + $0x68] sm:$0xff] }
   0x3   :  { %v623_v2 = vld [vmem:[%s825_s2 + $0xb8] sm:$0xff]  ;;  %341 = vmatpush.bf16.msra.mxu1 %v615_v1  ;;  %v622_v6 = vld [vmem:[%s825_s2 + $0xb0] sm:$0xff]  ;;  %v621_v10 = vld [vmem:[%s825_s2 + $0xa8] sm:$0xff]  ;;  %v399_v1 = vstv %s828_s0 }
   0x4   :  { %v631_v3 = vld [vmem:[%s825_s2 + $0xf8] sm:$0xff]  ;;  %360 = vmatpush.bf16.msra.mxu2 %v623_v2  ;;  %v630_v7 = vld [vmem:[%s825_s2 + $0xf0] sm:$0xff]  ;;  %v629_v11 = vld [vmem:[%s825_s2 + $0xe8] sm:$0xff] }
   0x5   :  { %379 = vmatpush.bf16.msra.mxu3 %v631_v3  ;;  %v604_v12 = vld [vmem:[%s825_s2 + $0x20] sm:$0xff]  ;;  %v603_v16 = vld [vmem:[%s825_s2 + $0x18] sm:$0xff]  ;;  %v602_v20 = vld [vmem:[%s825_s2 + $0x10] sm:$0xff] }
   0x6   :  { %323 = vmatpush.bf16.msra.mxu0 %v606_v4  ;;  %v612_v13 = vld [vmem:[%s825_s2 + $0x60] sm:$0xff]  ;;  %v611_v17 = vld [vmem:[%s825_s2 + $0x58] sm:$0xff]  ;;  %v610_v21 = vld [vmem:[%s825_s2 + $0x50] sm:$0xff] }
   0x7   :  { %342 = vmatpush.bf16.msra.mxu1 %v614_v5  ;;  %v620_v14 = vld [vmem:[%s825_s2 + $0xa0] sm:$0xff]  ;;  %v619_v18 = vld [vmem:[%s825_s2 + $0x98] sm:$0xff]  ;;  %v618_v22 = vld [vmem:[%s825_s2 + $0x90] sm:$0xff] }
   0x8   :  { %361 = vmatpush.bf16.msra.mxu2 %v622_v6  ;;  %v628_v15 = vld [vmem:[%s825_s2 + $0xe0] sm:$0xff]  ;;  %v627_v19 = vld [vmem:[%s825_s2 + $0xd8] sm:$0xff]  ;;  %v626_v23 = vld [vmem:[%s825_s2 + $0xd0] sm:$0xff] }
   0x9   :  { %380 = vmatpush.bf16.msra.mxu3 %v630_v7  ;;  %v601_v24 = vld [vmem:[%s825_s2 + $0x8] sm:$0xff]  ;;  %v600_v28 = vld [vmem:[%s825_s2] sm:$0xff]  ;;  %v594_v33 = vld [vmem:[%s826_s1 + $0xc] sm:$0xf0] }
   0xa   :  { %324 = vmatpush.bf16.msra.mxu0 %v605_v8  ;;  %v609_v25 = vld [vmem:[%s825_s2 + $0x48] sm:$0xff]  ;;  %v608_v29 = vld [vmem:[%s825_s2 + $0x40] sm:$0xff]  ;;  %v436_v35 = vld [vmem:[%s826_s1 + $0x10] sm:$0xf0] }
   0xb   :  { %343 = vmatpush.bf16.msra.mxu1 %v613_v9  ;;  %v617_v26 = vld [vmem:[%s825_s2 + $0x88] sm:$0xff]  ;;  %v616_v30 = vld [vmem:[%s825_s2 + $0x80] sm:$0xff]  ;;  %v595_v37 = vld [vmem:[%s826_s1 + $0x14] sm:$0xf0] }
   0xc   :  { %362 = vmatpush.bf16.msra.mxu2 %v621_v10  ;;  %v625_v27 = vld [vmem:[%s825_s2 + $0xc8] sm:$0xff]  ;;  %v624_v31 = vld [vmem:[%s825_s2 + $0xc0] sm:$0xff]  ;;  %v444_v39 = vld [vmem:[%s826_s1 + $0x18] sm:$0xf0] }
   0xd   :  { %381 = vmatpush.bf16.msra.mxu3 %v629_v11  ;;  %v434_v32 = vld [vmem:[%s826_s1] sm:$0xf]  ;;  %v592_v34 = vld [vmem:[%s826_s1 + $0x4] sm:$0xf]  ;;  %v442_v36 = vld [vmem:[%s826_s1 + $0x8] sm:$0xf] }
   0xe   :  { %325 = vmatpush.bf16.msra.mxu0 %v604_v12  ;;  %v593_v38 = vld [vmem:[%s826_s1 + $0xc] sm:$0xf]  ;;  %v435_v40 = vor.u32 %v594_v33, %v434_v32  ;;  %v439_v41 = vor.u32 %v592_v34, %v436_v35  ;;  %v443_v42 = vor.u32 %v595_v37, %v442_v36  ;;  %v450_v44 = vld [vmem:[%s826_s1 + $0x20] sm:$0xf]  ;;  %v598_v45 = vld [vmem:[%s826_s1 + $0x2c] sm:$0xf0] }
   0xf   :  { %344 = vmatpush.bf16.msra.mxu1 %v612_v13  ;;  %v447_v43 = vor.u32 %v593_v38, %v444_v39  ;;  %v596_v46 = vld [vmem:[%s826_s1 + $0x24] sm:$0xf]  ;;  %v452_v47 = vld [vmem:[%s826_s1 + $0x30] sm:$0xf0]  ;;  %v458_v48 = vld [vmem:[%s826_s1 + $0x28] sm:$0xf]  ;;  %v451_v52 = vor.u32 %v598_v45, %v450_v44 }
  0x10   :  { %363 = vmatpush.bf16.msra.mxu2 %v620_v14  ;;  %v599_v49 = vld [vmem:[%s826_s1 + $0x34] sm:$0xf0]  ;;  %v597_v50 = vld [vmem:[%s826_s1 + $0x2c] sm:$0xf]  ;;  %v460_v51 = vld [vmem:[%s826_s1 + $0x38] sm:$0xf0]  ;;  %v455_v53 = vor.u32 %v596_v46, %v452_v47 }
  0x11   :  { %382 = vmatpush.bf16.msra.mxu3 %v628_v15  ;;  %v459_v54 = vor.u32 %v599_v49, %v458_v48  ;;  %v463_v55 = vor.u32 %v597_v50, %v460_v51  ;;  %v643_v3 = vld [vmem:[%s827_s3] ss:$0 sm:$0xff] }
  0x12   :  { %326 = vmatpush.bf16.msra.mxu0 %v603_v16 }
  0x13   :  { %345 = vmatpush.bf16.msra.mxu1 %v611_v17 }
  0x14   :  { %364 = vmatpush.bf16.msra.mxu2 %v619_v18 }
  0x15   :  { %383 = vmatpush.bf16.msra.mxu3 %v627_v19 }
  0x16   :  { %327 = vmatpush.bf16.msra.mxu0 %v602_v20 }
  0x17   :  { %346 = vmatpush.bf16.msra.mxu1 %v610_v21 }
  0x18   :  { %365 = vmatpush.bf16.msra.mxu2 %v618_v22 }
  0x19   :  { %384 = vmatpush.bf16.msra.mxu3 %v626_v23 }
  0x1a   :  { %328 = vmatpush.bf16.msra.mxu0 %v601_v24 }
  0x1b   :  { %347 = vmatpush.bf16.msra.mxu1 %v609_v25 }
  0x1c   :  { %366 = vmatpush.bf16.msra.mxu2 %v617_v26 }
  0x1d   :  { %385 = vmatpush.bf16.msra.mxu3 %v625_v27 }
  0x1e   :  { %329 = vmatpush.bf16.msra.mxu0 %v600_v28 }
  0x1f   :  { %348 = vmatpush.bf16.msra.mxu1 %v608_v29 }
  0x20   :  { %367 = vmatpush.bf16.msra.mxu2 %v616_v30 }
  0x21   :  { %386 = vmatpush.bf16.msra.mxu3 %v624_v31  ;;  %330 = vmatmul.bf16.vlgmr.msra.gmra.mxu0 %v435_v40 }
  0x22   :  { %349 = vmatmul.bf16.vlgmr.msra.gmra.mxu1 %v439_v41 }
  0x23   :  { %368 = vmatmul.bf16.vlgmr.msra.gmra.mxu2 %v443_v42 }
  0x24   :  { %387 = vmatmul.bf16.vlgmr.msra.gmra.mxu3 %v447_v43 }
  0x31   :  { %335 = vmatmul.bf16.gmra.mxu0 %v451_v52 }
  0x32   :  { %354 = vmatmul.bf16.gmra.mxu1 %v455_v53 }
  0x33   :  { %373 = vmatmul.bf16.gmra.mxu2 %v459_v54 }
  0x34   :  { %392 = vmatmul.bf16.gmra.mxu3 %v463_v55 }
  0x9e   :  { %v331_v56 = vpop.f32.mrf.mxu0 }
  0x9f   :  { %v350_v57 = vpop.f32.mrf.mxu1 }
  0xa0   :  { %v351_v58 = vadd.f32 %v350_v57, %v331_v56 }
  0xa6   :  { %v369_v59 = vpop.f32.mrf.mxu2  ;;  %v333_v62 = vpop.f32.mrf.mxu0 }
  0xa7   :  { %v388_v60 = vpop.f32.mrf.mxu3  ;;  %v370_v61 = vadd.f32 %v369_v59, %v351_v58  ;;  %v352_v63 = vpop.f32.mrf.mxu1 }
  0xa8   :  { %v353_v4 = vadd.f32 %v352_v63, %v333_v62 }
  0xa9   :  { %v389_v0 = vadd.f32 %v388_v60, %v370_v61 }
  0xab   :  { %v400_v2 = vmul.f32 %v399_v1, %v389_v0 }
  0xad   :  { %v408_v10 = vadd.f32 %v643_v3, %v400_v2 }
  0xae   :  { %v371_v5 = vpop.f32.mrf.mxu2  ;;  %v336_v8 = vpop.f32.mrf.mxu0 }
  0xaf   :  { %v390_v6 = vpop.f32.mrf.mxu3  ;;  %v372_v7 = vadd.f32 %v371_v5, %v353_v4  ;;  %v355_v9 = vpop.f32.mrf.mxu1  ;;  %v412_v14 = vmul.f32 0.2, %v408_v10 }
  0xb0   :  { %v356_v13 = vadd.f32 %v355_v9, %v336_v8 }
  0xb1   :  { %v391_v11 = vadd.f32 %v390_v6, %v372_v7  ;;  %v416_v20 = vmax.f32 %v408_v10, %v412_v14 }
  0xb3   :  { %v401_v12 = vmul.f32 %v399_v1, %v391_v11 }
  0xb5   :  { %v409_v15 = vadd.f32 %v643_v3, %v401_v12 }
  0xb6   :  { %v374_v16 = vpop.f32.mrf.mxu2  ;;  %v338_v23 = vpop.f32.mrf.mxu0 }
  0xb7   :  { %v393_v17 = vpop.f32.mrf.mxu3  ;;  %v413_v18 = vmul.f32 0.2, %v409_v15  ;;  %v375_v19 = vadd.f32 %v374_v16, %v356_v13  ;;  %v357_v24 = vpop.f32.mrf.mxu1 }
  0xb8   :  { %v358_v27 = vadd.f32 %v357_v24, %v338_v23 }
  0xb9   :  { %v417_v21 = vmax.f32 %v409_v15, %v413_v18  ;;  %v394_v22 = vadd.f32 %v393_v17, %v375_v19 }
  0xbb   :  { %v635_v25 = vpack.c.bf16 %v417_v21, %v416_v20  ;;  %v402_v26 = vmul.f32 %v399_v1, %v394_v22 }
  0xbd   :  { %636 = vst [vmem:[%s829_s4] sm:$0xff] %v635_v25   ;;  %v410_v31 = vadd.f32 %v643_v3, %v402_v26 }
  0xbe   :  { %v376_v28 = vpop.f32.mrf.mxu2 }
  0xbf   :  { %v377_v29 = vadd.f32 %v376_v28, %v358_v27  ;;  %v395_v30 = vpop.f32.mrf.mxu3  ;;  %v414_v34 = vmul.f32 0.2, %v410_v31 }
  0xc1   :  { %v396_v32 = vadd.f32 %v395_v30, %v377_v29  ;;  %v418_v37 = vmax.f32 %v410_v31, %v414_v34 }
  0xc3   :  { %v403_v33 = vmul.f32 %v399_v1, %v396_v32 }
  0xc5   :  { %v411_v35 = vadd.f32 %v643_v3, %v403_v33 }
  0xc7   :  { %v415_v36 = vmul.f32 0.2, %v411_v35 }
  0xc9   :  { %v419_v38 = vmax.f32 %v411_v35, %v415_v36 }
  0xcb   :  { %v640_v39 = vpack.c.bf16 %v419_v38, %v418_v37 }
  0xcd   :  { %642 = vst [vmem:[%s829_s4 + $0x8] sm:$0xff] %v640_v39  }

// kernel: discriminator_forward.8
= control target key start
LH: loop header
LB: loop body
LE: loop exit
PB: predicated region body
PF: predicated region fallthrough
CT: control target
= control target key end

     0   :  { %s1195_s2 = inlined_call_operand.vmem [shape: bf16[896,128], index: 2, kind: input, shape index: {}]   ;;  %s1196_s1 = inlined_call_operand.vmem [shape: bf16[16,896], index: 1, kind: input, shape index: {}]   ;;  %s1197_s3 = inlined_call_operand.vmem [shape: f32[1,128], index: 3, kind: input, shape index: {}]   ;;  %s1198_s0 = inlined_call_operand.<no memory space> [shape: f32[1], index: 0, kind: input, shape index: {}]   ;;  %s1199_s4 = inlined_call_operand.vmem [shape: bf16[16,128], index: 4, kind: output, shape index: {}]  }
   0x1   :  { %v896_v0 = vld [vmem:[%s1195_s2 + $0x38] sm:$0xff]  ;;  %v895_v3 = vld [vmem:[%s1195_s2 + $0x30] sm:$0xff]  ;;  %v894_v8 = vld [vmem:[%s1195_s2 + $0x28] sm:$0xff] }
   0x2   :  { %v904_v1 = vld [vmem:[%s1195_s2 + $0x78] sm:$0xff]  ;;  %510 = vmatpush.bf16.msra.mxu0 %v896_v0  ;;  %v903_v4 = vld [vmem:[%s1195_s2 + $0x70] sm:$0xff]  ;;  %v902_v9 = vld [vmem:[%s1195_s2 + $0x68] sm:$0xff] }
   0x3   :  { %v912_v2 = vld [vmem:[%s1195_s2 + $0xb8] sm:$0xff]  ;;  %524 = vmatpush.bf16.msra.mxu1 %v904_v1  ;;  %v911_v6 = vld [vmem:[%s1195_s2 + $0xb0] sm:$0xff]  ;;  %v910_v10 = vld [vmem:[%s1195_s2 + $0xa8] sm:$0xff] }
   0x4   :  { %v920_v5 = vld [vmem:[%s1195_s2 + $0xf8] sm:$0xff]  ;;  %538 = vmatpush.bf16.msra.mxu2 %v912_v2  ;;  %v919_v7 = vld [vmem:[%s1195_s2 + $0xf0] sm:$0xff]  ;;  %v918_v11 = vld [vmem:[%s1195_s2 + $0xe8] sm:$0xff] }
   0x5   :  { %552 = vmatpush.bf16.msra.mxu3 %v920_v5  ;;  %v893_v12 = vld [vmem:[%s1195_s2 + $0x20] sm:$0xff]  ;;  %v892_v16 = vld [vmem:[%s1195_s2 + $0x18] sm:$0xff]  ;;  %v891_v20 = vld [vmem:[%s1195_s2 + $0x10] sm:$0xff] }
   0x6   :  { %511 = vmatpush.bf16.msra.mxu0 %v895_v3  ;;  %v901_v13 = vld [vmem:[%s1195_s2 + $0x60] sm:$0xff]  ;;  %v900_v17 = vld [vmem:[%s1195_s2 + $0x58] sm:$0xff]  ;;  %v899_v21 = vld [vmem:[%s1195_s2 + $0x50] sm:$0xff] }
   0x7   :  { %525 = vmatpush.bf16.msra.mxu1 %v903_v4  ;;  %v909_v14 = vld [vmem:[%s1195_s2 + $0xa0] sm:$0xff]  ;;  %v908_v18 = vld [vmem:[%s1195_s2 + $0x98] sm:$0xff]  ;;  %v907_v22 = vld [vmem:[%s1195_s2 + $0x90] sm:$0xff] }
   0x8   :  { %539 = vmatpush.bf16.msra.mxu2 %v911_v6  ;;  %v917_v15 = vld [vmem:[%s1195_s2 + $0xe0] sm:$0xff]  ;;  %v916_v19 = vld [vmem:[%s1195_s2 + $0xd8] sm:$0xff]  ;;  %v915_v23 = vld [vmem:[%s1195_s2 + $0xd0] sm:$0xff] }
   0x9   :  { %553 = vmatpush.bf16.msra.mxu3 %v919_v7  ;;  %v890_v24 = vld [vmem:[%s1195_s2 + $0x8] sm:$0xff]  ;;  %v889_v27 = vld [vmem:[%s1195_s2] sm:$0xff]  ;;  %v928_v31 = vld [vmem:[%s1195_s2 + $0x138] sm:$0xff] }
   0xa   :  { %512 = vmatpush.bf16.msra.mxu0 %v894_v8  ;;  %v898_v25 = vld [vmem:[%s1195_s2 + $0x48] sm:$0xff]  ;;  %v897_v29 = vld [vmem:[%s1195_s2 + $0x40] sm:$0xff]  ;;  %v885_v34 = vld [vmem:[%s1196_s1 + $0x18] sm:$0xf0] }
   0xb   :  { %526 = vmatpush.bf16.msra.mxu1 %v902_v9  ;;  %v906_v26 = vld [vmem:[%s1195_s2 + $0x88] sm:$0xff]  ;;  %v905_v30 = vld [vmem:[%s1195_s2 + $0x80] sm:$0xff]  ;;  %v936_v38 = vld [vmem:[%s1195_s2 + $0x178] sm:$0xff] }
   0xc   :  { %540 = vmatpush.bf16.msra.mxu2 %v910_v10  ;;  %v914_v28 = vld [vmem:[%s1195_s2 + $0xc8] sm:$0xff]  ;;  %v632_v33 = vld [vmem:[%s1196_s1] sm:$0xf]  ;;  %v886_v35 = vld [vmem:[%s1196_s1 + $0x20] sm:$0xf0] }
   0xd   :  { %554 = vmatpush.bf16.msra.mxu3 %v918_v11  ;;  %v640_v32 = vld [vmem:[%s1196_s1 + $0x8] sm:$0xf]  ;;  %v882_v36 = vld [vmem:[%s1196_s1 + $0x4] sm:$0xf]  ;;  %v634_v37 = vld [vmem:[%s1196_s1 + $0x1c] sm:$0xf0]  ;;  %v633_v41 = vor.u32 %v885_v34, %v632_v33  ;;  %v609_v34 = vstv %s1198_s0 }
   0xe   :  { %513 = vmatpush.bf16.msra.mxu0 %v893_v12  ;;  %v944_v39 = vld [vmem:[%s1195_s2 + $0x1b8] sm:$0xff]  ;;  %v913_v40 = vld [vmem:[%s1195_s2 + $0xc0] sm:$0xff]  ;;  %v641_v42 = vor.u32 %v886_v35, %v640_v32  ;;  %v883_v43 = vld [vmem:[%s1196_s1 + $0xc] sm:$0xf]  ;;  %v637_v45 = vor.u32 %v882_v36, %v634_v37 }
   0xf   :  { %527 = vmatpush.bf16.msra.mxu1 %v901_v13  ;;  %v642_v44 = vld [vmem:[%s1196_s1 + $0x24] sm:$0xf0]  ;;  %v927_v46 = vld [vmem:[%s1195_s2 + $0x130] sm:$0xff]  ;;  %v925_v53 = vld [vmem:[%s1195_s2 + $0x120] sm:$0xff] }
  0x10   :  { %541 = vmatpush.bf16.msra.mxu2 %v909_v14  ;;  %v935_v47 = vld [vmem:[%s1195_s2 + $0x170] sm:$0xff]  ;;  %v645_v49 = vor.u32 %v883_v43, %v642_v44  ;;  %v926_v50 = vld [vmem:[%s1195_s2 + $0x128] sm:$0xff]  ;;  %v933_v54 = vld [vmem:[%s1195_s2 + $0x160] sm:$0xff] }
  0x11   :  { %555 = vmatpush.bf16.msra.mxu3 %v917_v15  ;;  %v943_v48 = vld [vmem:[%s1195_s2 + $0x1b0] sm:$0xff]  ;;  %v934_v51 = vld [vmem:[%s1195_s2 + $0x168] sm:$0xff]  ;;  %v941_v55 = vld [vmem:[%s1195_s2 + $0x1a0] sm:$0xff] }
  0x12   :  { %514 = vmatpush.bf16.msra.mxu0 %v892_v16  ;;  %v942_v52 = vld [vmem:[%s1195_s2 + $0x1a8] sm:$0xff]  ;;  %v924_v56 = vld [vmem:[%s1195_s2 + $0x118] sm:$0xff]  ;;  %v923_v59 = vld [vmem:[%s1195_s2 + $0x110] sm:$0xff] }
  0x13   :  { %528 = vmatpush.bf16.msra.mxu1 %v900_v17  ;;  %v932_v57 = vld [vmem:[%s1195_s2 + $0x158] sm:$0xff]  ;;  %v931_v60 = vld [vmem:[%s1195_s2 + $0x150] sm:$0xff]  ;;  %v922_v62 = vld [vmem:[%s1195_s2 + $0x108] sm:$0xff] }
  0x14   :  { %542 = vmatpush.bf16.msra.mxu2 %v908_v18  ;;  %v940_v58 = vld [vmem:[%s1195_s2 + $0x198] sm:$0xff]  ;;  %v939_v61 = vld [vmem:[%s1195_s2 + $0x190] sm:$0xff]  ;;  %v930_v63 = vld [vmem:[%s1195_s2 + $0x148] sm:$0xff] }
  0x15   :  { %556 = vmatpush.bf16.msra.mxu3 %v916_v19  ;;  %v938_v0 = vld [vmem:[%s1195_s2 + $0x188] sm:$0xff]  ;;  %v921_v1 = vld [vmem:[%s1195_s2 + $0x100] sm:$0xff]  ;;  %v648_v4 = vld [vmem:[%s1196_s1 + $0x10] sm:$0xf] }
  0x16   :  { %515 = vmatpush.bf16.msra.mxu0 %v891_v20  ;;  %v929_v2 = vld [vmem:[%s1195_s2 + $0x140] sm:$0xff]  ;;  %v887_v5 = vld [vmem:[%s1196_s1 + $0x28] sm:$0xf0]  ;;  %v884_v6 = vld [vmem:[%s1196_s1 + $0x14] sm:$0xf] }
  0x17   :  { %529 = vmatpush.bf16.msra.mxu1 %v899_v21  ;;  %v937_v3 = vld [vmem:[%s1195_s2 + $0x180] sm:$0xff]  ;;  %v650_v7 = vld [vmem:[%s1196_s1 + $0x2c] sm:$0xf0]  ;;  %v656_v8 = vld [vmem:[%s1196_s1 + $0x18] sm:$0xf]  ;;  %v649_v10 = vor.u32 %v887_v5, %v648_v4 }
  0x18   :  { %543 = vmatpush.bf16.msra.mxu2 %v907_v22  ;;  %v888_v9 = vld [vmem:[%s1196_s1 + $0x30] sm:$0xf0]  ;;  %v653_v11 = vor.u32 %v884_v6, %v650_v7  ;;  %v950_v37 = vld [vmem:[%s1197_s3] ss:$0 sm:$0xff] }
  0x19   :  { %557 = vmatpush.bf16.msra.mxu3 %v915_v23  ;;  %v657_v12 = vor.u32 %v888_v9, %v656_v8 }
  0x1a   :  { %516 = vmatpush.bf16.msra.mxu0 %v890_v24 }
  0x1b   :  { %530 = vmatpush.bf16.msra.mxu1 %v898_v25 }
  0x1c   :  { %544 = vmatpush.bf16.msra.mxu2 %v906_v26 }
  0x1d   :  { %558 = vmatpush.bf16.msra.mxu3 %v914_v28 }
  0x1e   :  { %517 = vmatpush.bf16.msra.mxu0 %v889_v27 }
  0x1f   :  { %531 = vmatpush.bf16.msra.mxu1 %v897_v29 }
  0x20   :  { %545 = vmatpush.bf16.msra.mxu2 %v905_v30 }
  0x21   :  { %559 = vmatpush.bf16.msra.mxu3 %v913_v40  ;;  %518 = vmatmul.bf16.vlgmr.msra.gmra.mxu0 %v633_v41 }
  0x22   :  { %566 = vmatpush.bf16.msrb.mxu0 %v928_v31  ;;  %532 = vmatmul.bf16.vlgmr.msra.gmra.mxu1 %v637_v45 }
  0x23   :  { %580 = vmatpush.bf16.msrb.mxu1 %v936_v38  ;;  %546 = vmatmul.bf16.vlgmr.msra.gmra.mxu2 %v641_v42 }
  0x24   :  { %594 = vmatpush.bf16.msrb.mxu2 %v944_v39  ;;  %560 = vmatmul.bf16.vlgmr.msra.gmra.mxu3 %v645_v49 }
  0x26   :  { %567 = vmatpush.bf16.msrb.mxu0 %v927_v46 }
  0x27   :  { %581 = vmatpush.bf16.msrb.mxu1 %v935_v47 }
  0x28   :  { %595 = vmatpush.bf16.msrb.mxu2 %v943_v48 }
  0x2a   :  { %568 = vmatpush.bf16.msrb.mxu0 %v926_v50 }
  0x2b   :  { %582 = vmatpush.bf16.msrb.mxu1 %v934_v51 }
  0x2c   :  { %596 = vmatpush.bf16.msrb.mxu2 %v942_v52 }
  0x2e   :  { %569 = vmatpush.bf16.msrb.mxu0 %v925_v53 }
  0x2f   :  { %583 = vmatpush.bf16.msrb.mxu1 %v933_v54 }
  0x30   :  { %597 = vmatpush.bf16.msrb.mxu2 %v941_v55 }
  0x32   :  { %570 = vmatpush.bf16.msrb.mxu0 %v924_v56 }
  0x33   :  { %584 = vmatpush.bf16.msrb.mxu1 %v932_v57 }
  0x34   :  { %598 = vmatpush.bf16.msrb.mxu2 %v940_v58 }
  0x36   :  { %571 = vmatpush.bf16.msrb.mxu0 %v923_v59 }
  0x37   :  { %585 = vmatpush.bf16.msrb.mxu1 %v931_v60 }
  0x38   :  { %599 = vmatpush.bf16.msrb.mxu2 %v939_v61 }
  0x3a   :  { %572 = vmatpush.bf16.msrb.mxu0 %v922_v62 }
  0x3b   :  { %586 = vmatpush.bf16.msrb.mxu1 %v930_v63 }
  0x3c   :  { %600 = vmatpush.bf16.msrb.mxu2 %v938_v0 }
  0x3e   :  { %573 = vmatpush.bf16.msrb.mxu0 %v921_v1 }
  0x3f   :  { %587 = vmatpush.bf16.msrb.mxu1 %v929_v2 }
  0x40   :  { %601 = vmatpush.bf16.msrb.mxu2 %v937_v3 }
  0x41   :  { %574 = vmatmul.bf16.vlgmr.msrb.gmra.mxu0 %v649_v10 }
  0x42   :  { %588 = vmatmul.bf16.vlgmr.msrb.gmra.mxu1 %v653_v11 }
  0x43   :  { %602 = vmatmul.bf16.vlgmr.msrb.gmra.mxu2 %v657_v12 }
  0x9e   :  { %v519_v13 = vpop.f32.mrf.mxu0 }
  0x9f   :  { %v533_v14 = vpop.f32.mrf.mxu1 }
  0xa0   :  { %v534_v16 = vadd.f32 %v533_v14, %v519_v13 }
  0xa6   :  { %v547_v15 = vpop.f32.mrf.mxu2  ;;  %v521_v17 = vpop.f32.mrf.mxu0 }
  0xa7   :  { %v561_v18 = vpop.f32.mrf.mxu3  ;;  %v535_v19 = vpop.f32.mrf.mxu1  ;;  %v548_v20 = vadd.f32 %v547_v15, %v534_v16 }
  0xa8   :  { %v536_v23 = vadd.f32 %v535_v19, %v521_v17 }
  0xa9   :  { %v562_v22 = vadd.f32 %v561_v18, %v548_v20 }
  0xae   :  { %v549_v21 = vpop.f32.mrf.mxu2 }
  0xaf   :  { %v550_v27 = vadd.f32 %v549_v21, %v536_v23  ;;  %v563_v28 = vpop.f32.mrf.mxu3 }
  0xb1   :  { %v564_v31 = vadd.f32 %v563_v28, %v550_v27 }
  0xbe   :  { %v575_v24 = vpop.f32.mrf.mxu0 }
  0xbf   :  { %v576_v25 = vadd.f32 %v575_v24, %v562_v22  ;;  %v589_v26 = vpop.f32.mrf.mxu1 }
  0xc1   :  { %v590_v29 = vadd.f32 %v589_v26, %v576_v25 }
  0xc6   :  { %v603_v30 = vpop.f32.mrf.mxu2  ;;  %v577_v33 = vpop.f32.mrf.mxu0 }
  0xc7   :  { %v604_v32 = vadd.f32 %v603_v30, %v590_v29  ;;  %v578_v35 = vadd.f32 %v577_v33, %v564_v31  ;;  %v591_v38 = vpop.f32.mrf.mxu1 }
  0xc9   :  { %v610_v36 = vmul.f32 %v609_v34, %v604_v32  ;;  %v592_v39 = vadd.f32 %v591_v38, %v578_v35 }
  0xcb   :  { %v616_v41 = vadd.f32 %v950_v37, %v610_v36 }
  0xcd   :  { %v618_v44 = vmul.f32 0.2, %v616_v41 }
  0xce   :  { %v605_v40 = vpop.f32.mrf.mxu2 }
  0xcf   :  { %v606_v42 = vadd.f32 %v605_v40, %v592_v39  ;;  %v620_v47 = vmax.f32 %v616_v41, %v618_v44 }
  0xd1   :  { %v611_v43 = vmul.f32 %v609_v34, %v606_v42 }
  0xd3   :  { %v617_v45 = vadd.f32 %v950_v37, %v611_v43 }
  0xd5   :  { %v619_v46 = vmul.f32 0.2, %v617_v45 }
  0xd7   :  { %v621_v48 = vmax.f32 %v617_v45, %v619_v46 }
  0xd9   :  { %v948_v49 = vpack.c.bf16 %v621_v48, %v620_v47 }
  0xdb   :  { %949 = vst [vmem:[%s1199_s4] sm:$0xff] %v948_v49  }

// kernel: discriminator_forward.9
= control target key start
LH: loop header
LB: loop body
LE: loop exit
PB: predicated region body
PF: predicated region fallthrough
CT: control target
= control target key end

     0   :  { %s2149_s2 = inlined_call_operand.vmem [shape: bf16[1664,128], index: 2, kind: input, shape index: {}]   ;;  %s2150_s1 = inlined_call_operand.vmem [shape: bf16[16,1664], index: 1, kind: input, shape index: {}]   ;;  %s2151_s3 = inlined_call_operand.vmem [shape: f32[1,128], index: 3, kind: input, shape index: {}]   ;;  %s2152_s0 = inlined_call_operand.<no memory space> [shape: f32[1], index: 0, kind: input, shape index: {}]   ;;  %s2153_s4 = inlined_call_operand.vmem [shape: bf16[16,128], index: 4, kind: output, shape index: {}]  }
   0x1   :  { %v1622_v0 = vld [vmem:[%s2149_s2 + $0x38] sm:$0xff]  ;;  %v1621_v4 = vld [vmem:[%s2149_s2 + $0x30] sm:$0xff]  ;;  %v1620_v8 = vld [vmem:[%s2149_s2 + $0x28] sm:$0xff] }
   0x2   :  { %v1638_v1 = vld [vmem:[%s2149_s2 + $0xb8] sm:$0xff]  ;;  %930 = vmatpush.bf16.msra.mxu0 %v1622_v0  ;;  %v1637_v5 = vld [vmem:[%s2149_s2 + $0xb0] sm:$0xff]  ;;  %v1636_v9 = vld [vmem:[%s2149_s2 + $0xa8] sm:$0xff] }
   0x3   :  { %v1630_v2 = vld [vmem:[%s2149_s2 + $0x78] sm:$0xff]  ;;  %958 = vmatpush.bf16.msra.mxu2 %v1638_v1  ;;  %v1629_v6 = vld [vmem:[%s2149_s2 + $0x70] sm:$0xff]  ;;  %v1628_v10 = vld [vmem:[%s2149_s2 + $0x68] sm:$0xff] }
   0x4   :  { %v1646_v3 = vld [vmem:[%s2149_s2 + $0xf8] sm:$0xff]  ;;  %944 = vmatpush.bf16.msra.mxu1 %v1630_v2  ;;  %v1645_v7 = vld [vmem:[%s2149_s2 + $0xf0] sm:$0xff]  ;;  %v1644_v11 = vld [vmem:[%s2149_s2 + $0xe8] sm:$0xff] }
   0x5   :  { %972 = vmatpush.bf16.msra.mxu3 %v1646_v3  ;;  %v1619_v12 = vld [vmem:[%s2149_s2 + $0x20] sm:$0xff]  ;;  %v1618_v16 = vld [vmem:[%s2149_s2 + $0x18] sm:$0xff]  ;;  %v1617_v20 = vld [vmem:[%s2149_s2 + $0x10] sm:$0xff] }
   0x6   :  { %931 = vmatpush.bf16.msra.mxu0 %v1621_v4  ;;  %v1635_v13 = vld [vmem:[%s2149_s2 + $0xa0] sm:$0xff]  ;;  %v1634_v17 = vld [vmem:[%s2149_s2 + $0x98] sm:$0xff]  ;;  %v1633_v21 = vld [vmem:[%s2149_s2 + $0x90] sm:$0xff] }
   0x7   :  { %959 = vmatpush.bf16.msra.mxu2 %v1637_v5  ;;  %v1627_v14 = vld [vmem:[%s2149_s2 + $0x60] sm:$0xff]  ;;  %v1626_v18 = vld [vmem:[%s2149_s2 + $0x58] sm:$0xff]  ;;  %v1625_v22 = vld [vmem:[%s2149_s2 + $0x50] sm:$0xff] }
   0x8   :  { %945 = vmatpush.bf16.msra.mxu1 %v1629_v6  ;;  %v1643_v15 = vld [vmem:[%s2149_s2 + $0xe0] sm:$0xff]  ;;  %v1642_v19 = vld [vmem:[%s2149_s2 + $0xd8] sm:$0xff]  ;;  %v1641_v23 = vld [vmem:[%s2149_s2 + $0xd0] sm:$0xff] }
   0x9   :  { %973 = vmatpush.bf16.msra.mxu3 %v1645_v7  ;;  %v1616_v24 = vld [vmem:[%s2149_s2 + $0x8] sm:$0xff]  ;;  %v1615_v28 = vld [vmem:[%s2149_s2] sm:$0xff]  ;;  %v1654_v30 = vld [vmem:[%s2149_s2 + $0x138] sm:$0xff] }
   0xa   :  { %932 = vmatpush.bf16.msra.mxu0 %v1620_v8  ;;  %v1632_v25 = vld [vmem:[%s2149_s2 + $0x88] sm:$0xff]  ;;  %v1631_v29 = vld [vmem:[%s2149_s2 + $0x80] sm:$0xff]  ;;  %v1670_v31 = vld [vmem:[%s2149_s2 + $0x1b8] sm:$0xff] }
   0xb   :  { %960 = vmatpush.bf16.msra.mxu2 %v1636_v9  ;;  %v1624_v26 = vld [vmem:[%s2149_s2 + $0x48] sm:$0xff]  ;;  %v1623_v32 = vld [vmem:[%s2149_s2 + $0x40] sm:$0xff]  ;;  %v1608_v35 = vld [vmem:[%s2150_s1 + $0x30] sm:$0xf0] }
   0xc   :  { %946 = vmatpush.bf16.msra.mxu1 %v1628_v10  ;;  %v1640_v27 = vld [vmem:[%s2149_s2 + $0xc8] sm:$0xff]  ;;  %v1639_v33 = vld [vmem:[%s2149_s2 + $0xc0] sm:$0xff]  ;;  %v1609_v37 = vld [vmem:[%s2150_s1 + $0x38] sm:$0xf0] }
   0xd   :  { %974 = vmatpush.bf16.msra.mxu3 %v1644_v11  ;;  %v1136_v34 = vld [vmem:[%s2150_s1] sm:$0xf]  ;;  %v1144_v36 = vld [vmem:[%s2150_s1 + $0x8] sm:$0xf]  ;;  %v1662_v38 = vld [vmem:[%s2149_s2 + $0x178] sm:$0xff] }
   0xe   :  { %933 = vmatpush.bf16.msra.mxu0 %v1619_v12  ;;  %v1678_v39 = vld [vmem:[%s2149_s2 + $0x1f8] sm:$0xff]  ;;  %v1602_v40 = vld [vmem:[%s2150_s1 + $0x4] sm:$0xf]  ;;  %v1603_v42 = vld [vmem:[%s2150_s1 + $0xc] sm:$0xf]  ;;  %v1137_v44 = vor.u32 %v1608_v35, %v1136_v34  ;;  %v1145_v45 = vor.u32 %v1609_v37, %v1144_v36 }
   0xf   :  { %961 = vmatpush.bf16.msra.mxu2 %v1635_v13  ;;  %v1138_v41 = vld [vmem:[%s2150_s1 + $0x34] sm:$0xf0]  ;;  %v1146_v43 = vld [vmem:[%s2150_s1 + $0x3c] sm:$0xf0]  ;;  %v1653_v46 = vld [vmem:[%s2149_s2 + $0x130] sm:$0xff] }
  0x10   :  { %947 = vmatpush.bf16.msra.mxu1 %v1627_v14  ;;  %v1669_v47 = vld [vmem:[%s2149_s2 + $0x1b0] sm:$0xff]  ;;  %v1141_v48 = vor.u32 %v1602_v40, %v1138_v41  ;;  %v1149_v49 = vor.u32 %v1603_v42, %v1146_v43  ;;  %v1652_v52 = vld [vmem:[%s2149_s2 + $0x128] sm:$0xff]  ;;  %v1651_v56 = vld [vmem:[%s2149_s2 + $0x120] sm:$0xff] }
  0x11   :  { %975 = vmatpush.bf16.msra.mxu3 %v1643_v15  ;;  %v1661_v50 = vld [vmem:[%s2149_s2 + $0x170] sm:$0xff]  ;;  %v1668_v53 = vld [vmem:[%s2149_s2 + $0x1a8] sm:$0xff]  ;;  %v1667_v57 = vld [vmem:[%s2149_s2 + $0x1a0] sm:$0xff] }
  0x12   :  { %934 = vmatpush.bf16.msra.mxu0 %v1618_v16  ;;  %v1677_v51 = vld [vmem:[%s2149_s2 + $0x1f0] sm:$0xff]  ;;  %v1660_v54 = vld [vmem:[%s2149_s2 + $0x168] sm:$0xff]  ;;  %v1659_v58 = vld [vmem:[%s2149_s2 + $0x160] sm:$0xff] }
  0x13   :  { %962 = vmatpush.bf16.msra.mxu2 %v1634_v17  ;;  %v1676_v55 = vld [vmem:[%s2149_s2 + $0x1e8] sm:$0xff]  ;;  %v1675_v59 = vld [vmem:[%s2149_s2 + $0x1e0] sm:$0xff]  ;;  %v1650_v60 = vld [vmem:[%s2149_s2 + $0x118] sm:$0xff] }
  0x14   :  { %948 = vmatpush.bf16.msra.mxu1 %v1626_v18  ;;  %v1666_v61 = vld [vmem:[%s2149_s2 + $0x198] sm:$0xff]  ;;  %v1649_v0 = vld [vmem:[%s2149_s2 + $0x110] sm:$0xff]  ;;  %v1648_v4 = vld [vmem:[%s2149_s2 + $0x108] sm:$0xff] }
  0x15   :  { %976 = vmatpush.bf16.msra.mxu3 %v1642_v19  ;;  %v1658_v62 = vld [vmem:[%s2149_s2 + $0x158] sm:$0xff]  ;;  %v1665_v1 = vld [vmem:[%s2149_s2 + $0x190] sm:$0xff]  ;;  %v1664_v5 = vld [vmem:[%s2149_s2 + $0x188] sm:$0xff] }
  0x16   :  { %935 = vmatpush.bf16.msra.mxu0 %v1617_v20  ;;  %v1674_v63 = vld [vmem:[%s2149_s2 + $0x1d8] sm:$0xff]  ;;  %v1657_v2 = vld [vmem:[%s2149_s2 + $0x150] sm:$0xff]  ;;  %v1656_v6 = vld [vmem:[%s2149_s2 + $0x148] sm:$0xff] }
  0x17   :  { %963 = vmatpush.bf16.msra.mxu2 %v1633_v21  ;;  %v1673_v3 = vld [vmem:[%s2149_s2 + $0x1d0] sm:$0xff]  ;;  %v1672_v7 = vld [vmem:[%s2149_s2 + $0x1c8] sm:$0xff]  ;;  %v1647_v8 = vld [vmem:[%s2149_s2 + $0x100] sm:$0xff] }
  0x18   :  { %949 = vmatpush.bf16.msra.mxu1 %v1625_v22  ;;  %v1663_v9 = vld [vmem:[%s2149_s2 + $0x180] sm:$0xff]  ;;  %v1686_v10 = vld [vmem:[%s2149_s2 + $0x238] sm:$0xff]  ;;  %v1152_v12 = vld [vmem:[%s2150_s1 + $0x10] sm:$0xf] }
  0x19   :  { %977 = vmatpush.bf16.msra.mxu3 %v1641_v23  ;;  %v1702_v11 = vld [vmem:[%s2149_s2 + $0x2b8] sm:$0xff]  ;;  %v1610_v13 = vld [vmem:[%s2150_s1 + $0x40] sm:$0xf0]  ;;  %v1611_v15 = vld [vmem:[%s2150_s1 + $0x48] sm:$0xf0] }
  0x1a   :  { %936 = vmatpush.bf16.msra.mxu0 %v1616_v24  ;;  %v1160_v14 = vld [vmem:[%s2150_s1 + $0x18] sm:$0xf]  ;;  %v1655_v16 = vld [vmem:[%s2149_s2 + $0x140] sm:$0xff]  ;;  %v1604_v18 = vld [vmem:[%s2150_s1 + $0x14] sm:$0xf]  ;;  %v1153_v22 = vor.u32 %v1610_v13, %v1152_v12 }
  0x1b   :  { %964 = vmatpush.bf16.msra.mxu2 %v1632_v25  ;;  %v1671_v17 = vld [vmem:[%s2149_s2 + $0x1c0] sm:$0xff]  ;;  %v1154_v19 = vld [vmem:[%s2150_s1 + $0x44] sm:$0xf0]  ;;  %v1605_v20 = vld [vmem:[%s2150_s1 + $0x1c] sm:$0xf]  ;;  %v1161_v23 = vor.u32 %v1611_v15, %v1160_v14 }
  0x1c   :  { %950 = vmatpush.bf16.msra.mxu1 %v1624_v26  ;;  %v1162_v21 = vld [vmem:[%s2150_s1 + $0x4c] sm:$0xf0]  ;;  %v1694_v24 = vld [vmem:[%s2149_s2 + $0x278] sm:$0xff]  ;;  %v1157_v26 = vor.u32 %v1604_v18, %v1154_v19  ;;  %v1692_v34 = vld [vmem:[%s2149_s2 + $0x268] sm:$0xff] }
  0x1d   :  { %978 = vmatpush.bf16.msra.mxu3 %v1640_v27  ;;  %v1710_v25 = vld [vmem:[%s2149_s2 + $0x2f8] sm:$0xff]  ;;  %v1165_v27 = vor.u32 %v1605_v20, %v1162_v21  ;;  %v1708_v35 = vld [vmem:[%s2149_s2 + $0x2e8] sm:$0xff]  ;;  %v1683_v36 = vld [vmem:[%s2149_s2 + $0x220] sm:$0xff] }
  0x1e   :  { %937 = vmatpush.bf16.msra.mxu0 %v1615_v28  ;;  %v1685_v28 = vld [vmem:[%s2149_s2 + $0x230] sm:$0xff]  ;;  %v1699_v37 = vld [vmem:[%s2149_s2 + $0x2a0] sm:$0xff]  ;;  %v1682_v40 = vld [vmem:[%s2149_s2 + $0x218] sm:$0xff] }
  0x1f   :  { %965 = vmatpush.bf16.msra.mxu2 %v1631_v29  ;;  %v1701_v29 = vld [vmem:[%s2149_s2 + $0x2b0] sm:$0xff]  ;;  %v1698_v41 = vld [vmem:[%s2149_s2 + $0x298] sm:$0xff]  ;;  %v1614_v13 = vld [vmem:[%s2150_s1 + $0x60] sm:$0xf0] }
  0x20   :  { %951 = vmatpush.bf16.msra.mxu1 %v1623_v32  ;;  %v1684_v32 = vld [vmem:[%s2149_s2 + $0x228] sm:$0xff]  ;;  %v1690_v42 = vld [vmem:[%s2149_s2 + $0x258] sm:$0xff]  ;;  %v1184_v12 = vld [vmem:[%s2150_s1 + $0x30] sm:$0xf] }
  0x21   :  { %979 = vmatpush.bf16.msra.mxu3 %v1639_v33  ;;  %938 = vmatmul.bf16.vlgmr.msra.gmra.mxu0 %v1137_v44  ;;  %v1700_v33 = vld [vmem:[%s2149_s2 + $0x2a8] sm:$0xff]  ;;  %v1706_v43 = vld [vmem:[%s2149_s2 + $0x2d8] sm:$0xff]  ;;  %v1681_v44 = vld [vmem:[%s2149_s2 + $0x210] sm:$0xff]  ;;  %v1185_v14 = vor.u32 %v1614_v13, %v1184_v12 }
  0x22   :  { %986 = vmatpush.bf16.msrb.mxu0 %v1654_v30  ;;  %966 = vmatmul.bf16.vlgmr.msra.gmra.mxu2 %v1145_v45  ;;  %v1693_v30 = vld [vmem:[%s2149_s2 + $0x270] sm:$0xff] }
  0x23   :  { %1014 = vmatpush.bf16.msrb.mxu2 %v1670_v31  ;;  %952 = vmatmul.bf16.vlgmr.msra.gmra.mxu1 %v1141_v48  ;;  %v1709_v31 = vld [vmem:[%s2149_s2 + $0x2f0] sm:$0xff]  ;;  %v1680_v48 = vld [vmem:[%s2149_s2 + $0x208] sm:$0xff] }
  0x24   :  { %1000 = vmatpush.bf16.msrb.mxu1 %v1662_v38  ;;  %980 = vmatmul.bf16.vlgmr.msra.gmra.mxu3 %v1149_v49  ;;  %v1691_v38 = vld [vmem:[%s2149_s2 + $0x260] sm:$0xff]  ;;  %v1697_v45 = vld [vmem:[%s2149_s2 + $0x290] sm:$0xff]  ;;  %v1696_v49 = vld [vmem:[%s2149_s2 + $0x288] sm:$0xff] }
  0x25   :  { %1028 = vmatpush.bf16.msrb.mxu3 %v1678_v39  ;;  %v1707_v39 = vld [vmem:[%s2149_s2 + $0x2e0] sm:$0xff] }
  0x26   :  { %987 = vmatpush.bf16.msrb.mxu0 %v1653_v46  ;;  %v1689_v46 = vld [vmem:[%s2149_s2 + $0x250] sm:$0xff] }
  0x27   :  { %1015 = vmatpush.bf16.msrb.mxu2 %v1669_v47  ;;  %v1705_v47 = vld [vmem:[%s2149_s2 + $0x2d0] sm:$0xff] }
  0x28   :  { %1001 = vmatpush.bf16.msrb.mxu1 %v1661_v50  ;;  %v1688_v50 = vld [vmem:[%s2149_s2 + $0x248] sm:$0xff] }
  0x29   :  { %1029 = vmatpush.bf16.msrb.mxu3 %v1677_v51  ;;  %v1704_v51 = vld [vmem:[%s2149_s2 + $0x2c8] sm:$0xff] }
  0x2a   :  { %988 = vmatpush.bf16.msrb.mxu0 %v1652_v52  ;;  %v1679_v52 = vld [vmem:[%s2149_s2 + $0x200] sm:$0xff] }
  0x2b   :  { %1016 = vmatpush.bf16.msrb.mxu2 %v1668_v53  ;;  %v1695_v53 = vld [vmem:[%s2149_s2 + $0x280] sm:$0xff] }
  0x2c   :  { %1002 = vmatpush.bf16.msrb.mxu1 %v1660_v54  ;;  %v1718_v54 = vld [vmem:[%s2149_s2 + $0x338] sm:$0xff] }
  0x2d   :  { %1030 = vmatpush.bf16.msrb.mxu3 %v1676_v55  ;;  %v1168_v55 = vld [vmem:[%s2150_s1 + $0x20] sm:$0xf] }
  0x2e   :  { %989 = vmatpush.bf16.msrb.mxu0 %v1651_v56  ;;  %v1612_v56 = vld [vmem:[%s2150_s1 + $0x50] sm:$0xf0] }
  0x2f   :  { %1017 = vmatpush.bf16.msrb.mxu2 %v1667_v57  ;;  %v1176_v57 = vld [vmem:[%s2150_s1 + $0x28] sm:$0xf] }
  0x30   :  { %1003 = vmatpush.bf16.msrb.mxu1 %v1659_v58  ;;  %v1613_v58 = vld [vmem:[%s2150_s1 + $0x58] sm:$0xf0] }
  0x31   :  { %1031 = vmatpush.bf16.msrb.mxu3 %v1675_v59  ;;  %v1687_v59 = vld [vmem:[%s2149_s2 + $0x240] sm:$0xff] }
  0x32   :  { %990 = vmatpush.bf16.msrb.mxu0 %v1650_v60  ;;  %v1703_v60 = vld [vmem:[%s2149_s2 + $0x2c0] sm:$0xff] }
  0x33   :  { %1018 = vmatpush.bf16.msrb.mxu2 %v1666_v61  ;;  %v1606_v61 = vld [vmem:[%s2150_s1 + $0x24] sm:$0xf] }
  0x34   :  { %1004 = vmatpush.bf16.msrb.mxu1 %v1658_v62  ;;  %v1170_v62 = vld [vmem:[%s2150_s1 + $0x54] sm:$0xf0] }
  0x35   :  { %1032 = vmatpush.bf16.msrb.mxu3 %v1674_v63  ;;  %v1607_v63 = vld [vmem:[%s2150_s1 + $0x2c] sm:$0xf] }
  0x36   :  { %991 = vmatpush.bf16.msrb.mxu0 %v1649_v0  ;;  %v1178_v0 = vld [vmem:[%s2150_s1 + $0x5c] sm:$0xf0] }
  0x37   :  { %1019 = vmatpush.bf16.msrb.mxu2 %v1665_v1  ;;  %v1169_v1 = vor.u32 %v1612_v56, %v1168_v55 }
  0x38   :  { %1005 = vmatpush.bf16.msrb.mxu1 %v1657_v2  ;;  %v1177_v2 = vor.u32 %v1613_v58, %v1176_v57 }
  0x39   :  { %1033 = vmatpush.bf16.msrb.mxu3 %v1673_v3  ;;  %v1173_v3 = vor.u32 %v1606_v61, %v1170_v62 }
  0x3a   :  { %992 = vmatpush.bf16.msrb.mxu0 %v1648_v4  ;;  %v1181_v4 = vor.u32 %v1607_v63, %v1178_v0  ;;  %v1724_v0 = vld [vmem:[%s2151_s3] ss:$0 sm:$0xff] }
  0x3b   :  { %1020 = vmatpush.bf16.msrb.mxu2 %v1664_v5  ;;  %v1717_v5 = vld [vmem:[%s2149_s2 + $0x330] sm:$0xff] }
  0x3c   :  { %1006 = vmatpush.bf16.msrb.mxu1 %v1656_v6  ;;  %v1716_v6 = vld [vmem:[%s2149_s2 + $0x328] sm:$0xff] }
  0x3d   :  { %1034 = vmatpush.bf16.msrb.mxu3 %v1672_v7  ;;  %v1715_v7 = vld [vmem:[%s2149_s2 + $0x320] sm:$0xff] }
  0x3e   :  { %993 = vmatpush.bf16.msrb.mxu0 %v1647_v8  ;;  %v1714_v8 = vld [vmem:[%s2149_s2 + $0x318] sm:$0xff] }
  0x3f   :  { %1021 = vmatpush.bf16.msrb.mxu2 %v1663_v9  ;;  %v1713_v9 = vld [vmem:[%s2149_s2 + $0x310] sm:$0xff] }
  0x40   :  { %1007 = vmatpush.bf16.msrb.mxu1 %v1655_v16 }
  0x41   :  { %1035 = vmatpush.bf16.msrb.mxu3 %v1671_v17  ;;  %994 = vmatmul.bf16.vlgmr.msrb.gmra.mxu0 %v1153_v22 }
  0x42   :  { %1042 = vmatpush.bf16.msra.mxu0 %v1686_v10  ;;  %1022 = vmatmul.bf16.vlgmr.msrb.gmra.mxu2 %v1161_v23  ;;  %v1712_v10 = vld [vmem:[%s2149_s2 + $0x308] sm:$0xff] }
  0x43   :  { %1070 = vmatpush.bf16.msra.mxu2 %v1702_v11  ;;  %1008 = vmatmul.bf16.vlgmr.msrb.gmra.mxu1 %v1157_v26  ;;  %v1711_v11 = vld [vmem:[%s2149_s2 + $0x300] sm:$0xff] }
  0x44   :  { %1056 = vmatpush.bf16.msra.mxu1 %v1694_v24  ;;  %1036 = vmatmul.bf16.vlgmr.msrb.gmra.mxu3 %v1165_v27 }
  0x45   :  { %1084 = vmatpush.bf16.msra.mxu3 %v1710_v25 }
  0x46   :  { %1043 = vmatpush.bf16.msra.mxu0 %v1685_v28 }
  0x47   :  { %1071 = vmatpush.bf16.msra.mxu2 %v1701_v29 }
  0x48   :  { %1057 = vmatpush.bf16.msra.mxu1 %v1693_v30 }
  0x49   :  { %1085 = vmatpush.bf16.msra.mxu3 %v1709_v31 }
  0x4a   :  { %1044 = vmatpush.bf16.msra.mxu0 %v1684_v32 }
  0x4b   :  { %1072 = vmatpush.bf16.msra.mxu2 %v1700_v33 }
  0x4c   :  { %1058 = vmatpush.bf16.msra.mxu1 %v1692_v34 }
  0x4d   :  { %1086 = vmatpush.bf16.msra.mxu3 %v1708_v35 }
  0x4e   :  { %1045 = vmatpush.bf16.msra.mxu0 %v1683_v36 }
  0x4f   :  { %1073 = vmatpush.bf16.msra.mxu2 %v1699_v37 }
  0x50   :  { %1059 = vmatpush.bf16.msra.mxu1 %v1691_v38 }
  0x51   :  { %1087 = vmatpush.bf16.msra.mxu3 %v1707_v39 }
  0x52   :  { %1046 = vmatpush.bf16.msra.mxu0 %v1682_v40 }
  0x53   :  { %1074 = vmatpush.bf16.msra.mxu2 %v1698_v41 }
  0x54   :  { %1060 = vmatpush.bf16.msra.mxu1 %v1690_v42 }
  0x55   :  { %1088 = vmatpush.bf16.msra.mxu3 %v1706_v43 }
  0x56   :  { %1047 = vmatpush.bf16.msra.mxu0 %v1681_v44 }
  0x57   :  { %1075 = vmatpush.bf16.msra.mxu2 %v1697_v45 }
  0x58   :  { %1061 = vmatpush.bf16.msra.mxu1 %v1689_v46 }
  0x59   :  { %1089 = vmatpush.bf16.msra.mxu3 %v1705_v47 }
  0x5a   :  { %1048 = vmatpush.bf16.msra.mxu0 %v1680_v48 }
  0x5b   :  { %1076 = vmatpush.bf16.msra.mxu2 %v1696_v49 }
  0x5c   :  { %1062 = vmatpush.bf16.msra.mxu1 %v1688_v50 }
  0x5d   :  { %1090 = vmatpush.bf16.msra.mxu3 %v1704_v51 }
  0x5e   :  { %1049 = vmatpush.bf16.msra.mxu0 %v1679_v52 }
  0x5f   :  { %1077 = vmatpush.bf16.msra.mxu2 %v1695_v53 }
  0x60   :  { %1063 = vmatpush.bf16.msra.mxu1 %v1687_v59 }
  0x61   :  { %1091 = vmatpush.bf16.msra.mxu3 %v1703_v60  ;;  %1050 = vmatmul.bf16.vlgmr.msra.gmra.mxu0 %v1169_v1  ;;  %v1113_v60 = vstv %s2152_s0 }
  0x62   :  { %1098 = vmatpush.bf16.msrb.mxu0 %v1718_v54  ;;  %1078 = vmatmul.bf16.vlgmr.msra.gmra.mxu2 %v1177_v2 }
  0x63   :  { %1064 = vmatmul.bf16.vlgmr.msra.gmra.mxu1 %v1173_v3 }
  0x64   :  { %1092 = vmatmul.bf16.vlgmr.msra.gmra.mxu3 %v1181_v4 }
  0x66   :  { %1099 = vmatpush.bf16.msrb.mxu0 %v1717_v5 }
  0x6a   :  { %1100 = vmatpush.bf16.msrb.mxu0 %v1716_v6 }
  0x6e   :  { %1101 = vmatpush.bf16.msrb.mxu0 %v1715_v7 }
  0x72   :  { %1102 = vmatpush.bf16.msrb.mxu0 %v1714_v8 }
  0x76   :  { %1103 = vmatpush.bf16.msrb.mxu0 %v1713_v9 }
  0x7a   :  { %1104 = vmatpush.bf16.msrb.mxu0 %v1712_v10 }
  0x7e   :  { %1105 = vmatpush.bf16.msrb.mxu0 %v1711_v11 }
  0x81   :  { %1106 = vmatmul.bf16.vlgmr.msrb.gmra.mxu0 %v1185_v14 }
  0x9e   :  { %v939_v15 = vpop.f32.mrf.mxu0 }
  0xa0   :  { %v953_v16 = vpop.f32.mrf.mxu1 }
  0xa1   :  { %v954_v22 = vadd.f32 %v953_v16, %v939_v15 }
  0xa5   :  { %v967_v17 = vpop.f32.mrf.mxu2 }
  0xa6   :  { %v941_v18 = vpop.f32.mrf.mxu0  ;;  %v968_v25 = vadd.f32 %v967_v17, %v954_v22 }
  0xa7   :  { %v981_v19 = vpop.f32.mrf.mxu3 }
  0xa8   :  { %v955_v20 = vpop.f32.mrf.mxu1  ;;  %v982_v27 = vadd.f32 %v981_v19, %v968_v25 }
  0xa9   :  { %v956_v30 = vadd.f32 %v955_v20, %v941_v18 }
  0xad   :  { %v969_v21 = vpop.f32.mrf.mxu2 }
  0xae   :  { %v970_v33 = vadd.f32 %v969_v21, %v956_v30 }
  0xaf   :  { %v983_v24 = vpop.f32.mrf.mxu3 }
  0xb0   :  { %v984_v38 = vadd.f32 %v983_v24, %v970_v33 }
  0xbe   :  { %v995_v23 = vpop.f32.mrf.mxu0 }
  0xbf   :  { %v996_v31 = vadd.f32 %v995_v23, %v982_v27 }
  0xc0   :  { %v1009_v26 = vpop.f32.mrf.mxu1 }
  0xc1   :  { %v1010_v34 = vadd.f32 %v1009_v26, %v996_v31 }
  0xc5   :  { %v1023_v28 = vpop.f32.mrf.mxu2 }
  0xc6   :  { %v997_v29 = vpop.f32.mrf.mxu0  ;;  %v1024_v39 = vadd.f32 %v1023_v28, %v1010_v34 }
  0xc7   :  { %v1037_v32 = vpop.f32.mrf.mxu3  ;;  %v998_v40 = vadd.f32 %v997_v29, %v984_v38 }
  0xc8   :  { %v1011_v35 = vpop.f32.mrf.mxu1  ;;  %v1038_v42 = vadd.f32 %v1037_v32, %v1024_v39 }
  0xc9   :  { %v1012_v44 = vadd.f32 %v1011_v35, %v998_v40 }
  0xcd   :  { %v1025_v36 = vpop.f32.mrf.mxu2 }
  0xce   :  { %v1026_v47 = vadd.f32 %v1025_v36, %v1012_v44 }
  0xcf   :  { %v1039_v41 = vpop.f32.mrf.mxu3 }
  0xd0   :  { %v1040_v51 = vadd.f32 %v1039_v41, %v1026_v47 }
  0xde   :  { %v1051_v37 = vpop.f32.mrf.mxu0 }
  0xdf   :  { %v1052_v45 = vadd.f32 %v1051_v37, %v1038_v42 }
  0xe0   :  { %v1065_v43 = vpop.f32.mrf.mxu1 }
  0xe1   :  { %v1066_v49 = vadd.f32 %v1065_v43, %v1052_v45 }
  0xe5   :  { %v1079_v46 = vpop.f32.mrf.mxu2 }
  0xe6   :  { %v1053_v48 = vpop.f32.mrf.mxu0  ;;  %v1080_v52 = vadd.f32 %v1079_v46, %v1066_v49 }
  0xe7   :  { %v1093_v50 = vpop.f32.mrf.mxu3  ;;  %v1054_v53 = vadd.f32 %v1053_v48, %v1040_v51 }
  0xe8   :  { %v1067_v54 = vpop.f32.mrf.mxu1  ;;  %v1094_v55 = vadd.f32 %v1093_v50, %v1080_v52 }
  0xe9   :  { %v1068_v58 = vadd.f32 %v1067_v54, %v1054_v53 }
  0xed   :  { %v1081_v56 = vpop.f32.mrf.mxu2 }
  0xee   :  { %v1082_v61 = vadd.f32 %v1081_v56, %v1068_v58 }
  0xef   :  { %v1095_v62 = vpop.f32.mrf.mxu3 }
  0xf0   :  { %v1096_v1 = vadd.f32 %v1095_v62, %v1082_v61 }
  0xfe   :  { %v1107_v57 = vpop.f32.mrf.mxu0 }
  0xff   :  { %v1108_v59 = vadd.f32 %v1107_v57, %v1094_v55 }
 0x101   :  { %v1114_v63 = vmul.f32 %v1113_v60, %v1108_v59 }
 0x103   :  { %v1120_v3 = vadd.f32 %v1724_v0, %v1114_v63 }
 0x105   :  { %v1122_v6 = vmul.f32 0.2, %v1120_v3 }
 0x106   :  { %v1109_v2 = vpop.f32.mrf.mxu0 }
 0x107   :  { %v1110_v4 = vadd.f32 %v1109_v2, %v1096_v1  ;;  %v1124_v9 = vmax.f32 %v1120_v3, %v1122_v6 }
 0x109   :  { %v1115_v5 = vmul.f32 %v1113_v60, %v1110_v4 }
 0x10b   :  { %v1121_v7 = vadd.f32 %v1724_v0, %v1115_v5 }
 0x10d   :  { %v1123_v8 = vmul.f32 0.2, %v1121_v7 }
 0x10f   :  { %v1125_v10 = vmax.f32 %v1121_v7, %v1123_v8 }
 0x111   :  { %v1722_v11 = vpack.c.bf16 %v1125_v10, %v1124_v9 }
 0x113   :  { %1723 = vst [vmem:[%s2153_s4] sm:$0xff] %v1722_v11  }

</bundles_post_ra>
